<compile_context>
chip_gen: v6e
topology: v6e:2x2x1
jax: 0.10.0
libtpu: 0.0.40
codegen_flags: <defaults>
</compile_context>

<pallas_src>
import functools
import math

import jax
import jax.numpy as jnp
from jax.experimental import pallas as pl
from jax.experimental.pallas import tpu as pltpu


CFG = dict(vocab=100, hidden=128, heads=2, layers=2, intermediate=256,
           max_pos=32, type_vocab=2)


# ----------------------------------------------------------------------------
# Single fused encoder kernel: one (batch b, layer l) grid step does
#   [l==0] embedding LayerNorm into VMEM-resident x
#   QKV matmul -> per-head softmax attention -> output proj -> residual -> LN1
#   wi matmul -> GELU -> wf matmul -> residual -> LN2
#   [l==L-1] pooler dense + tanh on the CLS row
# ----------------------------------------------------------------------------
def _encoder_kernel(emb_ref, m_ref, eg_ref, eb_ref,
                    wqkv_ref, bqkv_ref, wo_ref, bo_ref, g1_ref, b1_ref,
                    wi_ref, bi_ref, wf_ref, bf_ref, g2_ref, b2_ref,
                    wp_ref, bp_ref,
                    pooled_ref,
                    x_vmem,
                    *, n_heads, head_dim, eps):
    l = pl.program_id(1)
    H = n_heads * head_dim

    def _ln(h, g, b):
        mean = jnp.mean(h, axis=-1, keepdims=True)
        c = h - mean
        var = jnp.mean(c * c, axis=-1, keepdims=True)
        return c * jax.lax.rsqrt(var + eps) * g + b

    # ---- layer 0: embedding LayerNorm into the VMEM-resident activation ----
    @pl.when(l == 0)
    def _():
        x_vmem[...] = _ln(emb_ref[0].astype(jnp.float32), eg_ref[...], eb_ref[...])

    x = x_vmem[...]                               # [S, H] f32, resident over L
    addm = m_ref[0]                               # [1, S] additive key mask

    # ---- attention block ----
    # Fused QKV projection: single MXU pass, lane-dense [S, 3H] result.
    # (1/sqrt(head_dim) is pre-folded into the Q weight/bias at init.)
    qkv = jnp.dot(x.astype(jnp.bfloat16), wqkv_ref[0],
                  preferred_element_type=jnp.float32) + bqkv_ref[0]
    q_all = qkv[:, :H]                            # 128-lane-aligned splits
    k_all = qkv[:, H:2 * H]
    v_all = qkv[:, 2 * H:]
    wo = wo_ref[0]                                # [H, H] bf16

    # TODO(synk): switch to lax.fori_loop over heads at BERT-base scale.
    attn = jnp.zeros_like(x)
    for h in range(n_heads):                      # static unroll (n_heads = 2)
        sl = slice(h * head_dim, (h + 1) * head_dim)
        q = q_all[:, sl].astype(jnp.bfloat16)
        k = k_all[:, sl].astype(jnp.bfloat16)
        v = v_all[:, sl].astype(jnp.bfloat16)
        # Contract the last axes directly -> no XLU transpose of K.
        s = jax.lax.dot_general(q, k, (((1,), (1,)), ((), ())),
                                preferred_element_type=jnp.float32) + addm
        s = s - jnp.max(s, axis=-1, keepdims=True)
        p = jnp.exp(s)
        p = p * pl.reciprocal(jnp.sum(p, axis=-1, keepdims=True), approx=True)
        ctx = jnp.dot(p.astype(jnp.bfloat16), v,
                      preferred_element_type=jnp.float32)
        # Accumulate the output projection per head: sublane slice of wo is
        # 8-aligned (free) and the lane concat over heads disappears.
        attn = attn + jnp.dot(ctx.astype(jnp.bfloat16), wo[sl, :],
                              preferred_element_type=jnp.float32)
    attn = attn + bo_ref[0]
    x1 = _ln(attn + x, g1_ref[0], b1_ref[0])      # residual + LN1

    # ---- FFN block (the [S, I] intermediate never leaves VMEM) ----
    inter = jnp.dot(x1.astype(jnp.bfloat16), wi_ref[0],
                    preferred_element_type=jnp.float32) + bi_ref[0]
    # tanh-approx GELU -> EUP slot; ~1e-3 deviation from HF's exact erf GELU.
    inter = jax.nn.gelu(inter, approximate=True)
    ffn = jnp.dot(inter.astype(jnp.bfloat16), wf_ref[0],
                  preferred_element_type=jnp.float32) + bf_ref[0]
    x_new = _ln(ffn + x1, g2_ref[0], b2_ref[0])   # residual + LN2
    x_vmem[...] = x_new

    # ---- final layer: fused pooler head (dense + tanh) on the CLS row ----
    @pl.when(l == pl.num_programs(1) - 1)
    def _():
        cls = x_new[0:1, :]
        y = jnp.dot(cls.astype(jnp.bfloat16), wp_ref[...],
                    preferred_element_type=jnp.float32) + bp_ref[...]
        pooled_ref[0] = jnp.tanh(y).astype(pooled_ref.dtype)


# ----------------------------------------------------------------------------
# Synthetic small-BERT parameters, stacked per-layer along a leading L axis.
# Matmul weights in bf16; biases / LN params in f32. The attention softmax
# scale 1/sqrt(head_dim) is folded into the Q projection (weight + bias).
# ----------------------------------------------------------------------------
def init_params(key, cfg):
    H, I, L = cfg["hidden"], cfg["intermediate"], cfg["layers"]
    dh = H // cfg["heads"]
    ks = iter(jax.random.split(key, 32))

    def nrm(shape):
        return 0.02 * jax.random.normal(next(ks), shape, jnp.float32)

    w_qkv = nrm((L, H, 3 * H))
    b_qkv = jnp.zeros((L, 1, 3 * H), jnp.float32)
    scale = 1.0 / math.sqrt(dh)
    w_qkv = w_qkv.at[:, :, :H].multiply(scale)    # fold softmax scale into Q
    b_qkv = b_qkv.at[:, :, :H].multiply(scale)

    return dict(
        word_emb=nrm((cfg["vocab"], H)),
        pos_emb=nrm((cfg["max_pos"], H)),
        type_emb=nrm((cfg["type_vocab"], H)),
        emb_ln_g=jnp.ones((1, H), jnp.float32),
        emb_ln_b=jnp.zeros((1, H), jnp.float32),
        w_qkv=w_qkv.astype(jnp.bfloat16),
        b_qkv=b_qkv,
        wo=nrm((L, H, H)).astype(jnp.bfloat16),
        bo=jnp.zeros((L, 1, H), jnp.float32),
        ln1_g=jnp.ones((L, 1, H), jnp.float32),
        ln1_b=jnp.zeros((L, 1, H), jnp.float32),
        wi=nrm((L, H, I)).astype(jnp.bfloat16),
        bi=jnp.zeros((L, 1, I), jnp.float32),
        wf=nrm((L, I, H)).astype(jnp.bfloat16),
        bf=jnp.zeros((L, 1, H), jnp.float32),
        ln2_g=jnp.ones((L, 1, H), jnp.float32),
        ln2_b=jnp.zeros((L, 1, H), jnp.float32),
        wp=nrm((H, H)).astype(jnp.bfloat16),
        bp=jnp.zeros((1, H), jnp.float32),
    )


# ----------------------------------------------------------------------------
# Forward pass (= NeuralNetwork.forward with output_way='pooler')
# ----------------------------------------------------------------------------
def neural_network_forward(params, input_ids, attention_mask, token_type_ids,
                           cfg=CFG):
    B, S = input_ids.shape
    H, I, L, nH = cfg["hidden"], cfg["intermediate"], cfg["layers"], cfg["heads"]

    # Embedding gather is glue (table lookup); all dense compute is in the
    # fused kernel. The summed embedding is the only HBM activation -> bf16.
    pos_ids = jnp.arange(S, dtype=jnp.int32)[None, :]
    emb = (params["word_emb"][input_ids]
           + params["pos_emb"][pos_ids]
           + params["type_emb"][token_type_ids]).astype(jnp.bfloat16)  # [B,S,H]

    # Additive mask precomputed once: 0.0 = keep, -1e9 = pad (scores stay f32).
    addmask = ((1.0 - attention_mask.astype(jnp.float32)) * -1e9).reshape(B, 1, S)

    kernel = functools.partial(_encoder_kernel, n_heads=nH, head_dim=H // nH,
                               eps=1e-12)

    layer_spec = lambda shape: pl.BlockSpec(shape, lambda b, l: (l, 0, 0))
    const_spec = lambda shape: pl.BlockSpec(shape, lambda b, l: (0, 0))

    pooled = pl.pallas_call(
        kernel,
        grid=(B, L),
        in_specs=[
            pl.BlockSpec((1, S, H), lambda b, l: (b, 0, 0)),   # emb (bf16)
            pl.BlockSpec((1, 1, S), lambda b, l: (b, 0, 0)),   # additive mask
            const_spec((1, H)),                                # emb ln gamma
            const_spec((1, H)),                                # emb ln beta
            layer_spec((1, H, 3 * H)),                         # w_qkv (bf16)
            layer_spec((1, 1, 3 * H)),                         # b_qkv
            layer_spec((1, H, H)),                             # wo (bf16)
            layer_spec((1, 1, H)),                             # bo
            layer_spec((1, 1, H)),                             # ln1 gamma
            layer_spec((1, 1, H)),                             # ln1 beta
            layer_spec((1, H, I)),                             # wi (bf16)
            layer_spec((1, 1, I)),                             # bi
            layer_spec((1, I, H)),                             # wf (bf16)
            layer_spec((1, 1, H)),                             # bf
            layer_spec((1, 1, H)),                             # ln2 gamma
            layer_spec((1, 1, H)),                             # ln2 beta
            const_spec((H, H)),                                # wp (bf16)
            const_spec((1, H)),                                # bp
        ],
        out_specs=pl.BlockSpec((1, 1, H), lambda b, l: (b, 0, 0)),
        out_shape=jax.ShapeDtypeStruct((B, 1, H), jnp.float32),
        scratch_shapes=[pltpu.VMEM((S, H), jnp.float32)],      # resident x
        compiler_params=pltpu.CompilerParams(
            dimension_semantics=("parallel", "arbitrary"),
            vmem_limit_bytes=32 * 1024 * 1024),
    )(emb, addmask, params["emb_ln_g"], params["emb_ln_b"],
      params["w_qkv"], params["b_qkv"], params["wo"], params["bo"],
      params["ln1_g"], params["ln1_b"],
      params["wi"], params["bi"], params["wf"], params["bf"],
      params["ln2_g"], params["ln2_b"],
      params["wp"], params["bp"])

    return pooled[:, 0, :]                                     # [B, H] 'pooler'


if __name__ == "__main__":
    key = jax.random.PRNGKey(0)
    k_param, k_ids = jax.random.split(key)

    B, S = 2, 8
    params = init_params(k_param, CFG)
    input_ids = jax.random.randint(k_ids, (B, S), 0, CFG["vocab"], dtype=jnp.int32)
    attention_mask = jnp.ones((B, S), dtype=jnp.int32)
    token_type_ids = jnp.zeros((B, S), dtype=jnp.int32)

    out = jax.jit(neural_network_forward)(params, input_ids, attention_mask,
                                          token_type_ids)
    out = jax.block_until_ready(out)
    assert out.shape == (B, CFG["hidden"]) and out.dtype == jnp.float32
    assert bool(jnp.all(jnp.isfinite(out)))
    print("KERNEL_OK")
</pallas_src>

<mosaic_0001>
module attributes {stable_mosaic.version = 11 : i64} {
  func.func @_encoder_kernel(%arg0: i32, %arg1: i32, %arg2: memref<1x8x128xbf16, #tpu.memory_space<vmem>>, %arg3: memref<1x1x8xf32, #tpu.memory_space<vmem>>, %arg4: memref<1x128xf32, #tpu.memory_space<vmem>>, %arg5: memref<1x128xf32, #tpu.memory_space<vmem>>, %arg6: memref<1x128x384xbf16, #tpu.memory_space<vmem>>, %arg7: memref<1x1x384xf32, #tpu.memory_space<vmem>>, %arg8: memref<1x128x128xbf16, #tpu.memory_space<vmem>>, %arg9: memref<1x1x128xf32, #tpu.memory_space<vmem>>, %arg10: memref<1x1x128xf32, #tpu.memory_space<vmem>>, %arg11: memref<1x1x128xf32, #tpu.memory_space<vmem>>, %arg12: memref<1x128x256xbf16, #tpu.memory_space<vmem>>, %arg13: memref<1x1x256xf32, #tpu.memory_space<vmem>>, %arg14: memref<1x256x128xbf16, #tpu.memory_space<vmem>>, %arg15: memref<1x1x128xf32, #tpu.memory_space<vmem>>, %arg16: memref<1x1x128xf32, #tpu.memory_space<vmem>>, %arg17: memref<1x1x128xf32, #tpu.memory_space<vmem>>, %arg18: memref<128x128xbf16, #tpu.memory_space<vmem>>, %arg19: memref<1x128xf32, #tpu.memory_space<vmem>>, %arg20: memref<1x1x128xf32, #tpu.memory_space<vmem>>, %arg21: memref<8x128xf32, #tpu.memory_space<vmem>>) attributes {dimension_semantics = [#tpu.dimension_semantics<parallel>, #tpu.dimension_semantics<arbitrary>], iteration_bounds = array<i64: 2, 2>, scalar_prefetch = 0 : i64, scratch_operands = 1 : i64, tpu.core_type = #tpu.core_type<tc>, window_params = [{transform_indices = @transform_0, window_bounds = array<i64: 1, 8, 128>}, {transform_indices = @transform_1, window_bounds = array<i64: 1, 1, 8>}, {pipeline_mode = #tpu.pipeline_mode<synchronous>, transform_indices = @transform_2, window_bounds = array<i64: 1, 128>}, {pipeline_mode = #tpu.pipeline_mode<synchronous>, transform_indices = @transform_3, window_bounds = array<i64: 1, 128>}, {transform_indices = @transform_4, window_bounds = array<i64: 1, 128, 384>}, {transform_indices = @transform_5, window_bounds = array<i64: 1, 1, 384>}, {transform_indices = @transform_6, window_bounds = array<i64: 1, 128, 128>}, {transform_indices = @transform_7, window_bounds = array<i64: 1, 1, 128>}, {transform_indices = @transform_8, window_bounds = array<i64: 1, 1, 128>}, {transform_indices = @transform_9, window_bounds = array<i64: 1, 1, 128>}, {transform_indices = @transform_10, window_bounds = array<i64: 1, 128, 256>}, {transform_indices = @transform_11, window_bounds = array<i64: 1, 1, 256>}, {transform_indices = @transform_12, window_bounds = array<i64: 1, 256, 128>}, {transform_indices = @transform_13, window_bounds = array<i64: 1, 1, 128>}, {transform_indices = @transform_14, window_bounds = array<i64: 1, 1, 128>}, {transform_indices = @transform_15, window_bounds = array<i64: 1, 1, 128>}, {pipeline_mode = #tpu.pipeline_mode<synchronous>, transform_indices = @transform_16, window_bounds = array<i64: 128, 128>}, {pipeline_mode = #tpu.pipeline_mode<synchronous>, transform_indices = @transform_17, window_bounds = array<i64: 1, 128>}, {transform_indices = @transform_18, window_bounds = array<i64: 1, 1, 128>}]} {
    %c0_i32 = arith.constant 0 : i32
    %0 = arith.cmpi eq, %arg1, %c0_i32 : i32
    %1 = arith.extui %0 : i1 to i32
    %c0_i32_0 = arith.constant 0 : i32
    %2 = arith.cmpi ne, %1, %c0_i32_0 : i32
    scf.if %2 {
      %c0_71 = arith.constant 0 : index
      %c0_72 = arith.constant 0 : index
      %c0_73 = arith.constant 0 : index
      %157 = vector.load %arg2[%c0_71, %c0_72, %c0_73] : memref<1x8x128xbf16, #tpu.memory_space<vmem>>, vector<1x8x128xbf16>
      %158 = vector.shape_cast %157 : vector<1x8x128xbf16> to vector<8x128xbf16>
      %159 = arith.extf %158 : vector<8x128xbf16> to vector<8x128xf32>
      %c0_74 = arith.constant 0 : index
      %c0_75 = arith.constant 0 : index
      %160 = vector.load %arg4[%c0_74, %c0_75] : memref<1x128xf32, #tpu.memory_space<vmem>>, vector<1x128xf32>
      %c0_76 = arith.constant 0 : index
      %c0_77 = arith.constant 0 : index
      %161 = vector.load %arg5[%c0_76, %c0_77] : memref<1x128xf32, #tpu.memory_space<vmem>>, vector<1x128xf32>
      %cst_78 = arith.constant dense<0.000000e+00> : vector<8xf32>
      %162 = vector.multi_reduction <add>, %159, %cst_78 [1] : vector<8x128xf32> to vector<8xf32>
      %163 = vector.shape_cast %162 : vector<8xf32> to vector<8x1xf32>
      %cst_79 = arith.constant 1.280000e+02 : f32
      %164 = vector.broadcast %cst_79 : f32 to vector<8x1xf32>
      %165 = arith.divf %163, %164 : vector<8x1xf32>
      %166 = vector.broadcast %165 : vector<8x1xf32> to vector<8x128xf32>
      %167 = arith.subf %159, %166 : vector<8x128xf32>
      %168 = arith.mulf %167, %167 : vector<8x128xf32>
      %cst_80 = arith.constant dense<0.000000e+00> : vector<8xf32>
      %169 = vector.multi_reduction <add>, %168, %cst_80 [1] : vector<8x128xf32> to vector<8xf32>
      %170 = vector.shape_cast %169 : vector<8xf32> to vector<8x1xf32>
      %cst_81 = arith.constant 1.280000e+02 : f32
      %171 = vector.broadcast %cst_81 : f32 to vector<8x1xf32>
      %172 = arith.divf %170, %171 : vector<8x1xf32>
      %cst_82 = arith.constant 9.99999996E-13 : f32
      %173 = vector.broadcast %cst_82 : f32 to vector<8x1xf32>
      %174 = arith.addf %172, %173 : vector<8x1xf32>
      %175 = math.rsqrt %174 : vector<8x1xf32>
      %176 = vector.broadcast %175 : vector<8x1xf32> to vector<8x128xf32>
      %177 = arith.mulf %167, %176 : vector<8x128xf32>
      %178 = vector.broadcast %160 : vector<1x128xf32> to vector<8x128xf32>
      %179 = arith.mulf %177, %178 : vector<8x128xf32>
      %180 = vector.broadcast %161 : vector<1x128xf32> to vector<8x128xf32>
      %181 = arith.addf %179, %180 : vector<8x128xf32>
      %c0_83 = arith.constant 0 : index
      %c0_84 = arith.constant 0 : index
      %182 = vector.load %arg21[%c0_83, %c0_84] : memref<8x128xf32, #tpu.memory_space<vmem>>, vector<8x128xf32>
      tpu.vector_store %arg21[%c0_83, %c0_84], %181 {strides = array<i32>} : memref<8x128xf32, #tpu.memory_space<vmem>>, vector<8x128xf32>,
    } else {
    }
    %c0 = arith.constant 0 : index
    %c0_1 = arith.constant 0 : index
    %3 = vector.load %arg21[%c0, %c0_1] : memref<8x128xf32, #tpu.memory_space<vmem>>, vector<8x128xf32>
    %c0_2 = arith.constant 0 : index
    %c0_3 = arith.constant 0 : index
    %c0_4 = arith.constant 0 : index
    %4 = vector.load %arg3[%c0_2, %c0_3, %c0_4] : memref<1x1x8xf32, #tpu.memory_space<vmem>>, vector<1x1x8xf32>
    %5 = vector.shape_cast %4 : vector<1x1x8xf32> to vector<1x8xf32>
    %6 = arith.truncf %3 : vector<8x128xf32> to vector<8x128xbf16>
    %c0_5 = arith.constant 0 : index
    %c0_6 = arith.constant 0 : index
    %c0_7 = arith.constant 0 : index
    %7 = vector.load %arg6[%c0_5, %c0_6, %c0_7] : memref<1x128x384xbf16, #tpu.memory_space<vmem>>, vector<1x128x384xbf16>
    %8 = vector.shape_cast %7 : vector<1x128x384xbf16> to vector<128x384xbf16>
    %cst = arith.constant dense<0.000000e+00> : vector<8x384xf32>
    %9 = tpu.matmul %6, %8, %cst {dimension_numbers = #tpu.dot_dimension_numbers<[1], [0], [0], [1], [0, 0, 1, 1], [], []>} : vector<8x128xbf16>, vector<128x384xbf16>, vector<8x384xf32> -> vector<8x384xf32>
    %c0_8 = arith.constant 0 : index
    %c0_9 = arith.constant 0 : index
    %c0_10 = arith.constant 0 : index
    %10 = vector.load %arg7[%c0_8, %c0_9, %c0_10] : memref<1x1x384xf32, #tpu.memory_space<vmem>>, vector<1x1x384xf32>
    %11 = vector.shape_cast %10 : vector<1x1x384xf32> to vector<1x384xf32>
    %12 = vector.broadcast %11 : vector<1x384xf32> to vector<8x384xf32>
    %13 = arith.addf %9, %12 : vector<8x384xf32>
    %14 = vector.extract_strided_slice %13 {offsets = [0, 0], sizes = [8, 128], strides = [1, 1]} : vector<8x384xf32> to vector<8x128xf32>
    %15 = vector.extract_strided_slice %13 {offsets = [0, 128], sizes = [8, 128], strides = [1, 1]} : vector<8x384xf32> to vector<8x128xf32>
    %16 = vector.extract_strided_slice %13 {offsets = [0, 256], sizes = [8, 128], strides = [1, 1]} : vector<8x384xf32> to vector<8x128xf32>
    %c0_11 = arith.constant 0 : index
    %c0_12 = arith.constant 0 : index
    %c0_13 = arith.constant 0 : index
    %17 = vector.load %arg8[%c0_11, %c0_12, %c0_13] : memref<1x128x128xbf16, #tpu.memory_space<vmem>>, vector<1x128x128xbf16>
    %18 = vector.shape_cast %17 : vector<1x128x128xbf16> to vector<128x128xbf16>
    %cst_14 = arith.constant 0.000000e+00 : f32
    %19 = vector.broadcast %cst_14 : f32 to vector<8x128xf32>
    %20 = vector.extract_strided_slice %14 {offsets = [0, 0], sizes = [8, 64], strides = [1, 1]} : vector<8x128xf32> to vector<8x64xf32>
    %21 = arith.truncf %20 : vector<8x64xf32> to vector<8x64xbf16>
    %22 = vector.extract_strided_slice %15 {offsets = [0, 0], sizes = [8, 64], strides = [1, 1]} : vector<8x128xf32> to vector<8x64xf32>
    %23 = arith.truncf %22 : vector<8x64xf32> to vector<8x64xbf16>
    %24 = vector.extract_strided_slice %16 {offsets = [0, 0], sizes = [8, 64], strides = [1, 1]} : vector<8x128xf32> to vector<8x64xf32>
    %25 = arith.truncf %24 : vector<8x64xf32> to vector<8x64xbf16>
    %cst_15 = arith.constant dense<0.000000e+00> : vector<8x8xf32>
    %26 = tpu.matmul %21, %23, %cst_15 {dimension_numbers = #tpu.dot_dimension_numbers<[1], [1], [0], [0], [0, 0, 1, 0], [], []>} : vector<8x64xbf16>, vector<8x64xbf16>, vector<8x8xf32> -> vector<8x8xf32>
    %27 = vector.broadcast %5 : vector<1x8xf32> to vector<8x8xf32>
    %28 = arith.addf %26, %27 : vector<8x8xf32>
    %cst_16 = arith.constant dense<0xFF800000> : vector<8xf32>
    %29 = vector.multi_reduction <maximumf>, %28, %cst_16 [1] : vector<8x8xf32> to vector<8xf32>
    %30 = vector.shape_cast %29 : vector<8xf32> to vector<8x1xf32>
    %31 = vector.broadcast %30 : vector<8x1xf32> to vector<8x8xf32>
    %32 = arith.subf %28, %31 : vector<8x8xf32>
    %33 = math.exp %32 : vector<8x8xf32>
    %cst_17 = arith.constant dense<0.000000e+00> : vector<8xf32>
    %34 = vector.multi_reduction <add>, %33, %cst_17 [1] : vector<8x8xf32> to vector<8xf32>
    %35 = vector.shape_cast %34 : vector<8xf32> to vector<8x1xf32>
    %36 = tpu.reciprocal %35 {approx = true} : vector<8x1xf32> -> vector<8x1xf32>
    %37 = vector.broadcast %36 : vector<8x1xf32> to vector<8x8xf32>
    %38 = arith.mulf %33, %37 : vector<8x8xf32>
    %39 = arith.truncf %38 : vector<8x8xf32> to vector<8x8xbf16>
    %cst_18 = arith.constant dense<0.000000e+00> : vector<8x64xf32>
    %40 = tpu.matmul %39, %25, %cst_18 {dimension_numbers = #tpu.dot_dimension_numbers<[1], [0], [0], [1], [0, 0, 1, 1], [], []>} : vector<8x8xbf16>, vector<8x64xbf16>, vector<8x64xf32> -> vector<8x64xf32>
    %41 = arith.truncf %40 : vector<8x64xf32> to vector<8x64xbf16>
    %42 = vector.extract_strided_slice %18 {offsets = [0, 0], sizes = [64, 128], strides = [1, 1]} : vector<128x128xbf16> to vector<64x128xbf16>
    %cst_19 = arith.constant dense<0.000000e+00> : vector<8x128xf32>
    %43 = tpu.matmul %41, %42, %cst_19 {dimension_numbers = #tpu.dot_dimension_numbers<[1], [0], [0], [1], [0, 0, 1, 1], [], []>} : vector<8x64xbf16>, vector<64x128xbf16>, vector<8x128xf32> -> vector<8x128xf32>
    %44 = arith.addf %19, %43 : vector<8x128xf32>
    %45 = vector.extract_strided_slice %14 {offsets = [0, 64], sizes = [8, 64], strides = [1, 1]} : vector<8x128xf32> to vector<8x64xf32>
    %46 = arith.truncf %45 : vector<8x64xf32> to vector<8x64xbf16>
    %47 = vector.extract_strided_slice %15 {offsets = [0, 64], sizes = [8, 64], strides = [1, 1]} : vector<8x128xf32> to vector<8x64xf32>
    %48 = arith.truncf %47 : vector<8x64xf32> to vector<8x64xbf16>
    %49 = vector.extract_strided_slice %16 {offsets = [0, 64], sizes = [8, 64], strides = [1, 1]} : vector<8x128xf32> to vector<8x64xf32>
    %50 = arith.truncf %49 : vector<8x64xf32> to vector<8x64xbf16>
    %cst_20 = arith.constant dense<0.000000e+00> : vector<8x8xf32>
    %51 = tpu.matmul %46, %48, %cst_20 {dimension_numbers = #tpu.dot_dimension_numbers<[1], [1], [0], [0], [0, 0, 1, 0], [], []>} : vector<8x64xbf16>, vector<8x64xbf16>, vector<8x8xf32> -> vector<8x8xf32>
    %52 = vector.broadcast %5 : vector<1x8xf32> to vector<8x8xf32>
    %53 = arith.addf %51, %52 : vector<8x8xf32>
    %cst_21 = arith.constant dense<0xFF800000> : vector<8xf32>
    %54 = vector.multi_reduction <maximumf>, %53, %cst_21 [1] : vector<8x8xf32> to vector<8xf32>
    %55 = vector.shape_cast %54 : vector<8xf32> to vector<8x1xf32>
    %56 = vector.broadcast %55 : vector<8x1xf32> to vector<8x8xf32>
    %57 = arith.subf %53, %56 : vector<8x8xf32>
    %58 = math.exp %57 : vector<8x8xf32>
    %cst_22 = arith.constant dense<0.000000e+00> : vector<8xf32>
    %59 = vector.multi_reduction <add>, %58, %cst_22 [1] : vector<8x8xf32> to vector<8xf32>
    %60 = vector.shape_cast %59 : vector<8xf32> to vector<8x1xf32>
    %61 = tpu.reciprocal %60 {approx = true} : vector<8x1xf32> -> vector<8x1xf32>
    %62 = vector.broadcast %61 : vector<8x1xf32> to vector<8x8xf32>
    %63 = arith.mulf %58, %62 : vector<8x8xf32>
    %64 = arith.truncf %63 : vector<8x8xf32> to vector<8x8xbf16>
    %cst_23 = arith.constant dense<0.000000e+00> : vector<8x64xf32>
    %65 = tpu.matmul %64, %50, %cst_23 {dimension_numbers = #tpu.dot_dimension_numbers<[1], [0], [0], [1], [0, 0, 1, 1], [], []>} : vector<8x8xbf16>, vector<8x64xbf16>, vector<8x64xf32> -> vector<8x64xf32>
    %66 = arith.truncf %65 : vector<8x64xf32> to vector<8x64xbf16>
    %67 = vector.extract_strided_slice %18 {offsets = [64, 0], sizes = [64, 128], strides = [1, 1]} : vector<128x128xbf16> to vector<64x128xbf16>
    %cst_24 = arith.constant dense<0.000000e+00> : vector<8x128xf32>
    %68 = tpu.matmul %66, %67, %cst_24 {dimension_numbers = #tpu.dot_dimension_numbers<[1], [0], [0], [1], [0, 0, 1, 1], [], []>} : vector<8x64xbf16>, vector<64x128xbf16>, vector<8x128xf32> -> vector<8x128xf32>
    %69 = arith.addf %44, %68 : vector<8x128xf32>
    %c0_25 = arith.constant 0 : index
    %c0_26 = arith.constant 0 : index
    %c0_27 = arith.constant 0 : index
    %70 = vector.load %arg9[%c0_25, %c0_26, %c0_27] : memref<1x1x128xf32, #tpu.memory_space<vmem>>, vector<1x1x128xf32>
    %71 = vector.shape_cast %70 : vector<1x1x128xf32> to vector<1x128xf32>
    %72 = vector.broadcast %71 : vector<1x128xf32> to vector<8x128xf32>
    %73 = arith.addf %69, %72 : vector<8x128xf32>
    %74 = arith.addf %73, %3 : vector<8x128xf32>
    %c0_28 = arith.constant 0 : index
    %c0_29 = arith.constant 0 : index
    %c0_30 = arith.constant 0 : index
    %75 = vector.load %arg10[%c0_28, %c0_29, %c0_30] : memref<1x1x128xf32, #tpu.memory_space<vmem>>, vector<1x1x128xf32>
    %76 = vector.shape_cast %75 : vector<1x1x128xf32> to vector<1x128xf32>
    %c0_31 = arith.constant 0 : index
    %c0_32 = arith.constant 0 : index
    %c0_33 = arith.constant 0 : index
    %77 = vector.load %arg11[%c0_31, %c0_32, %c0_33] : memref<1x1x128xf32, #tpu.memory_space<vmem>>, vector<1x1x128xf32>
    %78 = vector.shape_cast %77 : vector<1x1x128xf32> to vector<1x128xf32>
    %cst_34 = arith.constant dense<0.000000e+00> : vector<8xf32>
    %79 = vector.multi_reduction <add>, %74, %cst_34 [1] : vector<8x128xf32> to vector<8xf32>
    %80 = vector.shape_cast %79 : vector<8xf32> to vector<8x1xf32>
    %cst_35 = arith.constant 1.280000e+02 : f32
    %81 = vector.broadcast %cst_35 : f32 to vector<8x1xf32>
    %82 = arith.divf %80, %81 : vector<8x1xf32>
    %83 = vector.broadcast %82 : vector<8x1xf32> to vector<8x128xf32>
    %84 = arith.subf %74, %83 : vector<8x128xf32>
    %85 = arith.mulf %84, %84 : vector<8x128xf32>
    %cst_36 = arith.constant dense<0.000000e+00> : vector<8xf32>
    %86 = vector.multi_reduction <add>, %85, %cst_36 [1] : vector<8x128xf32> to vector<8xf32>
    %87 = vector.shape_cast %86 : vector<8xf32> to vector<8x1xf32>
    %cst_37 = arith.constant 1.280000e+02 : f32
    %88 = vector.broadcast %cst_37 : f32 to vector<8x1xf32>
    %89 = arith.divf %87, %88 : vector<8x1xf32>
    %cst_38 = arith.constant 9.99999996E-13 : f32
    %90 = vector.broadcast %cst_38 : f32 to vector<8x1xf32>
    %91 = arith.addf %89, %90 : vector<8x1xf32>
    %92 = math.rsqrt %91 : vector<8x1xf32>
    %93 = vector.broadcast %92 : vector<8x1xf32> to vector<8x128xf32>
    %94 = arith.mulf %84, %93 : vector<8x128xf32>
    %95 = vector.broadcast %76 : vector<1x128xf32> to vector<8x128xf32>
    %96 = arith.mulf %94, %95 : vector<8x128xf32>
    %97 = vector.broadcast %78 : vector<1x128xf32> to vector<8x128xf32>
    %98 = arith.addf %96, %97 : vector<8x128xf32>
    %99 = arith.truncf %98 : vector<8x128xf32> to vector<8x128xbf16>
    %c0_39 = arith.constant 0 : index
    %c0_40 = arith.constant 0 : index
    %c0_41 = arith.constant 0 : index
    %100 = vector.load %arg12[%c0_39, %c0_40, %c0_41] : memref<1x128x256xbf16, #tpu.memory_space<vmem>>, vector<1x128x256xbf16>
    %101 = vector.shape_cast %100 : vector<1x128x256xbf16> to vector<128x256xbf16>
    %cst_42 = arith.constant dense<0.000000e+00> : vector<8x256xf32>
    %102 = tpu.matmul %99, %101, %cst_42 {dimension_numbers = #tpu.dot_dimension_numbers<[1], [0], [0], [1], [0, 0, 1, 1], [], []>} : vector<8x128xbf16>, vector<128x256xbf16>, vector<8x256xf32> -> vector<8x256xf32>
    %c0_43 = arith.constant 0 : index
    %c0_44 = arith.constant 0 : index
    %c0_45 = arith.constant 0 : index
    %103 = vector.load %arg13[%c0_43, %c0_44, %c0_45] : memref<1x1x256xf32, #tpu.memory_space<vmem>>, vector<1x1x256xf32>
    %104 = vector.shape_cast %103 : vector<1x1x256xf32> to vector<1x256xf32>
    %105 = vector.broadcast %104 : vector<1x256xf32> to vector<8x256xf32>
    %106 = arith.addf %102, %105 : vector<8x256xf32>
    %107 = arith.mulf %106, %106 : vector<8x256xf32>
    %108 = arith.mulf %106, %107 : vector<8x256xf32>
    %cst_46 = arith.constant 4.471500e-02 : f32
    %109 = vector.broadcast %cst_46 : f32 to vector<8x256xf32>
    %110 = arith.mulf %109, %108 : vector<8x256xf32>
    %111 = arith.addf %106, %110 : vector<8x256xf32>
    %cst_47 = arith.constant 0.797884583 : f32
    %112 = vector.broadcast %cst_47 : f32 to vector<8x256xf32>
    %113 = arith.mulf %112, %111 : vector<8x256xf32>
    %114 = math.tanh %113 : vector<8x256xf32>
    %cst_48 = arith.constant 1.000000e+00 : f32
    %115 = vector.broadcast %cst_48 : f32 to vector<8x256xf32>
    %116 = arith.addf %115, %114 : vector<8x256xf32>
    %cst_49 = arith.constant 5.000000e-01 : f32
    %117 = vector.broadcast %cst_49 : f32 to vector<8x256xf32>
    %118 = arith.mulf %117, %116 : vector<8x256xf32>
    %119 = arith.mulf %106, %118 : vector<8x256xf32>
    %120 = arith.truncf %119 : vector<8x256xf32> to vector<8x256xbf16>
    %c0_50 = arith.constant 0 : index
    %c0_51 = arith.constant 0 : index
    %c0_52 = arith.constant 0 : index
    %121 = vector.load %arg14[%c0_50, %c0_51, %c0_52] : memref<1x256x128xbf16, #tpu.memory_space<vmem>>, vector<1x256x128xbf16>
    %122 = vector.shape_cast %121 : vector<1x256x128xbf16> to vector<256x128xbf16>
    %cst_53 = arith.constant dense<0.000000e+00> : vector<8x128xf32>
    %123 = tpu.matmul %120, %122, %cst_53 {dimension_numbers = #tpu.dot_dimension_numbers<[1], [0], [0], [1], [0, 0, 1, 1], [], []>} : vector<8x256xbf16>, vector<256x128xbf16>, vector<8x128xf32> -> vector<8x128xf32>
    %c0_54 = arith.constant 0 : index
    %c0_55 = arith.constant 0 : index
    %c0_56 = arith.constant 0 : index
    %124 = vector.load %arg15[%c0_54, %c0_55, %c0_56] : memref<1x1x128xf32, #tpu.memory_space<vmem>>, vector<1x1x128xf32>
    %125 = vector.shape_cast %124 : vector<1x1x128xf32> to vector<1x128xf32>
    %126 = vector.broadcast %125 : vector<1x128xf32> to vector<8x128xf32>
    %127 = arith.addf %123, %126 : vector<8x128xf32>
    %128 = arith.addf %127, %98 : vector<8x128xf32>
    %c0_57 = arith.constant 0 : index
    %c0_58 = arith.constant 0 : index
    %c0_59 = arith.constant 0 : index
    %129 = vector.load %arg16[%c0_57, %c0_58, %c0_59] : memref<1x1x128xf32, #tpu.memory_space<vmem>>, vector<1x1x128xf32>
    %130 = vector.shape_cast %129 : vector<1x1x128xf32> to vector<1x128xf32>
    %c0_60 = arith.constant 0 : index
    %c0_61 = arith.constant 0 : index
    %c0_62 = arith.constant 0 : index
    %131 = vector.load %arg17[%c0_60, %c0_61, %c0_62] : memref<1x1x128xf32, #tpu.memory_space<vmem>>, vector<1x1x128xf32>
    %132 = vector.shape_cast %131 : vector<1x1x128xf32> to vector<1x128xf32>
    %cst_63 = arith.constant dense<0.000000e+00> : vector<8xf32>
    %133 = vector.multi_reduction <add>, %128, %cst_63 [1] : vector<8x128xf32> to vector<8xf32>
    %134 = vector.shape_cast %133 : vector<8xf32> to vector<8x1xf32>
    %cst_64 = arith.constant 1.280000e+02 : f32
    %135 = vector.broadcast %cst_64 : f32 to vector<8x1xf32>
    %136 = arith.divf %134, %135 : vector<8x1xf32>
    %137 = vector.broadcast %136 : vector<8x1xf32> to vector<8x128xf32>
    %138 = arith.subf %128, %137 : vector<8x128xf32>
    %139 = arith.mulf %138, %138 : vector<8x128xf32>
    %cst_65 = arith.constant dense<0.000000e+00> : vector<8xf32>
    %140 = vector.multi_reduction <add>, %139, %cst_65 [1] : vector<8x128xf32> to vector<8xf32>
    %141 = vector.shape_cast %140 : vector<8xf32> to vector<8x1xf32>
    %cst_66 = arith.constant 1.280000e+02 : f32
    %142 = vector.broadcast %cst_66 : f32 to vector<8x1xf32>
    %143 = arith.divf %141, %142 : vector<8x1xf32>
    %cst_67 = arith.constant 9.99999996E-13 : f32
    %144 = vector.broadcast %cst_67 : f32 to vector<8x1xf32>
    %145 = arith.addf %143, %144 : vector<8x1xf32>
    %146 = math.rsqrt %145 : vector<8x1xf32>
    %147 = vector.broadcast %146 : vector<8x1xf32> to vector<8x128xf32>
    %148 = arith.mulf %138, %147 : vector<8x128xf32>
    %149 = vector.broadcast %130 : vector<1x128xf32> to vector<8x128xf32>
    %150 = arith.mulf %148, %149 : vector<8x128xf32>
    %151 = vector.broadcast %132 : vector<1x128xf32> to vector<8x128xf32>
    %152 = arith.addf %150, %151 : vector<8x128xf32>
    %c0_68 = arith.constant 0 : index
    %c0_69 = arith.constant 0 : index
    %153 = vector.load %arg21[%c0_68, %c0_69] : memref<8x128xf32, #tpu.memory_space<vmem>>, vector<8x128xf32>
    tpu.vector_store %arg21[%c0_68, %c0_69], %152 {strides = array<i32>} : memref<8x128xf32, #tpu.memory_space<vmem>>, vector<8x128xf32>,
    %c1_i32 = arith.constant 1 : i32
    %154 = arith.cmpi eq, %arg1, %c1_i32 : i32
    %155 = arith.extui %154 : i1 to i32
    %c0_i32_70 = arith.constant 0 : i32
    %156 = arith.cmpi ne, %155, %c0_i32_70 : i32
    scf.if %156 {
      %157 = vector.extract_strided_slice %152 {offsets = [0, 0], sizes = [1, 128], strides = [1, 1]} : vector<8x128xf32> to vector<1x128xf32>
      %158 = arith.truncf %157 : vector<1x128xf32> to vector<1x128xbf16>
      %c0_71 = arith.constant 0 : index
      %c0_72 = arith.constant 0 : index
      %159 = vector.load %arg18[%c0_71, %c0_72] : memref<128x128xbf16, #tpu.memory_space<vmem>>, vector<128x128xbf16>
      %cst_73 = arith.constant dense<0.000000e+00> : vector<1x128xf32>
      %160 = tpu.matmul %158, %159, %cst_73 {dimension_numbers = #tpu.dot_dimension_numbers<[1], [0], [0], [1], [0, 0, 1, 1], [], []>} : vector<1x128xbf16>, vector<128x128xbf16>, vector<1x128xf32> -> vector<1x128xf32>
      %c0_74 = arith.constant 0 : index
      %c0_75 = arith.constant 0 : index
      %161 = vector.load %arg19[%c0_74, %c0_75] : memref<1x128xf32, #tpu.memory_space<vmem>>, vector<1x128xf32>
      %162 = arith.addf %160, %161 : vector<1x128xf32>
      %163 = math.tanh %162 : vector<1x128xf32>
      %c0_76 = arith.constant 0 : index
      %c0_77 = arith.constant 0 : index
      %c0_78 = arith.constant 0 : index
      %164 = vector.load %arg20[%c0_76, %c0_77, %c0_78] : memref<1x1x128xf32, #tpu.memory_space<vmem>>, vector<1x1x128xf32>
      %165 = vector.shape_cast %164 : vector<1x1x128xf32> to vector<1x128xf32>
      %166 = vector.shape_cast %163 : vector<1x128xf32> to vector<1x1x128xf32>
      tpu.vector_store %arg20[%c0_76, %c0_77, %c0_78], %166 {strides = array<i32>} : memref<1x1x128xf32, #tpu.memory_space<vmem>>, vector<1x1x128xf32>,
    } else {
    }
    return
  }
  func.func @transform_0(%arg0: i32, %arg1: i32) -> (i32, i32, i32) {
    %c0_i32 = arith.constant 0 : i32
    %c0_i32_0 = arith.constant 0 : i32
    %c0_i32_1 = arith.constant 0 : i32
    return %arg0, %c0_i32, %c0_i32_0 : i32, i32, i32
  }
  func.func @transform_1(%arg0: i32, %arg1: i32) -> (i32, i32, i32) {
    %c0_i32 = arith.constant 0 : i32
    %c0_i32_0 = arith.constant 0 : i32
    %c0_i32_1 = arith.constant 0 : i32
    return %arg0, %c0_i32, %c0_i32_0 : i32, i32, i32
  }
  func.func @transform_2(%arg0: i32, %arg1: i32) -> (i32, i32) {
    %c0_i32 = arith.constant 0 : i32
    %c0_i32_0 = arith.constant 0 : i32
    %c0_i32_1 = arith.constant 0 : i32
    return %c0_i32, %c0_i32_0 : i32, i32
  }
  func.func @transform_3(%arg0: i32, %arg1: i32) -> (i32, i32) {
    %c0_i32 = arith.constant 0 : i32
    %c0_i32_0 = arith.constant 0 : i32
    %c0_i32_1 = arith.constant 0 : i32
    return %c0_i32, %c0_i32_0 : i32, i32
  }
  func.func @transform_4(%arg0: i32, %arg1: i32) -> (i32, i32, i32) {
    %c0_i32 = arith.constant 0 : i32
    %c0_i32_0 = arith.constant 0 : i32
    %c0_i32_1 = arith.constant 0 : i32
    return %arg1, %c0_i32, %c0_i32_0 : i32, i32, i32
  }
  func.func @transform_5(%arg0: i32, %arg1: i32) -> (i32, i32, i32) {
    %c0_i32 = arith.constant 0 : i32
    %c0_i32_0 = arith.constant 0 : i32
    %c0_i32_1 = arith.constant 0 : i32
    return %arg1, %c0_i32, %c0_i32_0 : i32, i32, i32
  }
  func.func @transform_6(%arg0: i32, %arg1: i32) -> (i32, i32, i32) {
    %c0_i32 = arith.constant 0 : i32
    %c0_i32_0 = arith.constant 0 : i32
    %c0_i32_1 = arith.constant 0 : i32
    return %arg1, %c0_i32, %c0_i32_0 : i32, i32, i32
  }
  func.func @transform_7(%arg0: i32, %arg1: i32) -> (i32, i32, i32) {
    %c0_i32 = arith.constant 0 : i32
    %c0_i32_0 = arith.constant 0 : i32
    %c0_i32_1 = arith.constant 0 : i32
    return %arg1, %c0_i32, %c0_i32_0 : i32, i32, i32
  }
  func.func @transform_8(%arg0: i32, %arg1: i32) -> (i32, i32, i32) {
    %c0_i32 = arith.constant 0 : i32
    %c0_i32_0 = arith.constant 0 : i32
    %c0_i32_1 = arith.constant 0 : i32
    return %arg1, %c0_i32, %c0_i32_0 : i32, i32, i32
  }
  func.func @transform_9(%arg0: i32, %arg1: i32) -> (i32, i32, i32) {
    %c0_i32 = arith.constant 0 : i32
    %c0_i32_0 = arith.constant 0 : i32
    %c0_i32_1 = arith.constant 0 : i32
    return %arg1, %c0_i32, %c0_i32_0 : i32, i32, i32
  }
  func.func @transform_10(%arg0: i32, %arg1: i32) -> (i32, i32, i32) {
    %c0_i32 = arith.constant 0 : i32
    %c0_i32_0 = arith.constant 0 : i32
    %c0_i32_1 = arith.constant 0 : i32
    return %arg1, %c0_i32, %c0_i32_0 : i32, i32, i32
  }
  func.func @transform_11(%arg0: i32, %arg1: i32) -> (i32, i32, i32) {
    %c0_i32 = arith.constant 0 : i32
    %c0_i32_0 = arith.constant 0 : i32
    %c0_i32_1 = arith.constant 0 : i32
    return %arg1, %c0_i32, %c0_i32_0 : i32, i32, i32
  }
  func.func @transform_12(%arg0: i32, %arg1: i32) -> (i32, i32, i32) {
    %c0_i32 = arith.constant 0 : i32
    %c0_i32_0 = arith.constant 0 : i32
    %c0_i32_1 = arith.constant 0 : i32
    return %arg1, %c0_i32, %c0_i32_0 : i32, i32, i32
  }
  func.func @transform_13(%arg0: i32, %arg1: i32) -> (i32, i32, i32) {
    %c0_i32 = arith.constant 0 : i32
    %c0_i32_0 = arith.constant 0 : i32
    %c0_i32_1 = arith.constant 0 : i32
    return %arg1, %c0_i32, %c0_i32_0 : i32, i32, i32
  }
  func.func @transform_14(%arg0: i32, %arg1: i32) -> (i32, i32, i32) {
    %c0_i32 = arith.constant 0 : i32
    %c0_i32_0 = arith.constant 0 : i32
    %c0_i32_1 = arith.constant 0 : i32
    return %arg1, %c0_i32, %c0_i32_0 : i32, i32, i32
  }
  func.func @transform_15(%arg0: i32, %arg1: i32) -> (i32, i32, i32) {
    %c0_i32 = arith.constant 0 : i32
    %c0_i32_0 = arith.constant 0 : i32
    %c0_i32_1 = arith.constant 0 : i32
    return %arg1, %c0_i32, %c0_i32_0 : i32, i32, i32
  }
  func.func @transform_16(%arg0: i32, %arg1: i32) -> (i32, i32) {
    %c0_i32 = arith.constant 0 : i32
    %c0_i32_0 = arith.constant 0 : i32
    %c0_i32_1 = arith.constant 0 : i32
    return %c0_i32, %c0_i32_0 : i32, i32
  }
  func.func @transform_17(%arg0: i32, %arg1: i32) -> (i32, i32) {
    %c0_i32 = arith.constant 0 : i32
    %c0_i32_0 = arith.constant 0 : i32
    %c0_i32_1 = arith.constant 0 : i32
    return %c0_i32, %c0_i32_0 : i32, i32
  }
  func.func @transform_18(%arg0: i32, %arg1: i32) -> (i32, i32, i32) {
    %c0_i32 = arith.constant 0 : i32
    %c0_i32_0 = arith.constant 0 : i32
    %c0_i32_1 = arith.constant 0 : i32
    return %arg0, %c0_i32, %c0_i32_0 : i32, i32, i32
  }
}

</mosaic_0001>

<bundles_post_ra>
// kernel: neural_network_forward.1
= control target key start
LH: loop header
LB: loop body
LE: loop exit
PB: predicated region body
PF: predicated region fallthrough
CT: control target
= control target key end

     0   :  { %s3606_s0 = inlined_call_operand.vmem [shape: bf16[2,8,128], index: 0, kind: input, shape index: {}]   ;;  %s3607_s1 = inlined_call_operand.vmem [shape: f32[2,1,8], index: 1, kind: input, shape index: {}]   ;;  %s3608_s2 = inlined_call_operand.vmem [shape: f32[1,128], index: 2, kind: input, shape index: {}]   ;;  %s3609_s3 = inlined_call_operand.vmem [shape: f32[1,128], index: 3, kind: input, shape index: {}]   ;;  %s3610_s4 = inlined_call_operand.hbm [shape: bf16[2,128,384], index: 4, kind: input, shape index: {}]   ;;  %s3611_s5 = inlined_call_operand.vmem [shape: f32[2,1,384], index: 5, kind: input, shape index: {}]   ;;  %s3612_s6 = inlined_call_operand.vmem [shape: bf16[2,128,128], index: 6, kind: input, shape index: {}]   ;;  %s3613_s7 = inlined_call_operand.vmem [shape: f32[2,1,128], index: 7, kind: input, shape index: {}]   ;;  %s3614_s8 = inlined_call_operand.vmem [shape: f32[2,1,128], index: 8, kind: input, shape index: {}]   ;;  %s3615_s9 = inlined_call_operand.vmem [shape: f32[2,1,128], index: 9, kind: input, shape index: {}]   ;;  %s3616_s10 = inlined_call_operand.vmem [shape: bf16[2,128,256], index: 10, kind: input, shape index: {}]   ;;  %s3617_s11 = inlined_call_operand.vmem [shape: f32[2,1,256], index: 11, kind: input, shape index: {}]   ;;  %s3618_s12 = inlined_call_operand.hbm [shape: bf16[2,256,128], index: 12, kind: input, shape index: {}]   ;;  %s3619_s13 = inlined_call_operand.vmem [shape: f32[2,1,128], index: 13, kind: input, shape index: {}]   ;;  %s3620_s14 = inlined_call_operand.vmem [shape: f32[2,1,128], index: 14, kind: input, shape index: {}]   ;;  %s3621_s15 = inlined_call_operand.vmem [shape: f32[2,1,128], index: 15, kind: input, shape index: {}]   ;;  %s3622_s16 = inlined_call_operand.hbm [shape: bf16[128,128], index: 16, kind: input, shape index: {}]   ;;  %s3623_s17 = inlined_call_operand.vmem [shape: f32[1,128], index: 17, kind: input, shape index: {}]   ;;  %s3624_s18 = inlined_call_operand.hbm [shape: f32[2,1,128], index: 18, kind: output, shape index: {}]  }
   0x1   :  { %3644 = sst [smem:[#allocation29_spill]] %s3606_s0 }
   0x2   :  { %3645 = sst [smem:[#allocation30_spill]] %s3607_s1 }
   0x3   :  { %3646 = sst [smem:[#allocation31_spill]] %s3608_s2 }
   0x4   :  { %3647 = sst [smem:[#allocation32_spill]] %s3609_s3 }
   0x5   :  { %3648 = sst [smem:[#allocation33_spill]] %s3610_s4 }
   0x6   :  { %3649 = sst [smem:[#allocation34_spill]] %s3611_s5 }
   0x7   :  { %3650 = sst [smem:[#allocation35_spill]] %s3612_s6 }
   0x8   :  { %3651 = sst [smem:[#allocation36_spill]] %s3614_s8 }
   0x9   :  { %3652 = sst [smem:[#allocation37_spill]] %s3615_s9 }
   0xa   :  { %3653 = sst [smem:[#allocation38_spill]] %s3616_s10 }
   0xb   :  { %3654 = sst [smem:[#allocation39_spill]] %s3617_s11 }
   0xc   :  { %3655 = sst [smem:[#allocation40_spill]] %s3618_s12 }
   0xd   :  { %3656 = sst [smem:[#allocation41_spill]] %s3619_s13 }
   0xe   :  { %3657 = sst [smem:[#allocation42_spill]] %s3620_s14 }
   0xf   :  { %3658 = sst [smem:[#allocation43_spill]] %s3621_s15 }
  0x10   :  { %3659 = sst [smem:[#allocation44_spill]] %s3622_s16 }
  0x11   :  { %3660 = sst [smem:[#allocation45_spill]] %s3623_s17 }
  0x12   :  { %3661 = sst [smem:[#allocation46_spill]] %s3624_s18 }
  0x13   :  { %23 = vsyncpa [#allocation4], 0 }
  0x14   :  { %25 = vsyncpa [#allocation4 + $0x1], 0 }
  0x15   :  { %26 = vsyncpa [#allocation7], 0 }
  0x16   :  { %28 = vsyncpa [#allocation7 + $0x1], 0 }
  0x17   :  { %29 = vsyncpa [#allocation5], 0 }
  0x18   :  { %31 = vsyncpa [#allocation5 + $0x1], 0  ;;  %s3114_s27 = smov 0   ;;  %s3116_s28 = smov 0  }
  0x19   :  { %s3118_s29 = smov 0   ;;  %s3120_s30 = smov 0  }
  0x1a   :  { %s3122_s0 = smov 0   ;;  %s3124_s19 = smov 0  }
  0x1b   :  { %s3126_s1 = smov 0   ;;  %s3128_s20 = smov 0  }
  0x1c   :  { %s3130_s21 = smov 0   ;;  %s3132_s22 = smov 0  }
  0x1d   :  { %s3134_s2 = smov 0  }
  0x1e LB: > { %3662 = sst [smem:[#allocation14_spill]] %s2963_s27  ;;  %s3168_s23 = sadd.s32 4294967295, %s3003_s2   ;;  %s3003_s2 = sphi %s3134_s2, %s37_s2   ;;  %s2999_s22 = sphi %s3132_s22, %s3731_s22   ;;  %s2995_s21 = sphi %s3130_s21, %s3730_s21   ;;  %s2991_s20 = sphi %s3128_s20, %s3729_s20   ;;  %s2987_s1 = sphi %s3126_s1, %s3728_s1   ;;  %s2983_s19 = sphi %s3124_s19, %s3727_s19   ;;  %s2979_s0 = sphi %s3122_s0, %s3726_s0   ;;  %s2975_s30 = sphi %s3120_s30, %s3725_s30   ;;  %s2971_s29 = sphi %s3118_s29, %s3724_s29   ;;  %s2967_s28 = sphi %s3116_s28, %s3733_s28   ;;  %s2963_s27 = sphi %s3114_s27, %s3732_s27  }
  0x1f   : > { %3663 = sst [smem:[#allocation15_spill]] %s2971_s29  ;;  %s2295_s24 = sadd.s32 4294967294, %s3003_s2  }
  0x20   : > { %3664 = sst [smem:[#allocation16_spill]] %s2979_s0  ;;  %p163_p0 = scmp.ne.s32.totalorder %s2979_s0, %s2975_s30 }
  0x21   : > { %3665 = sst [smem:[#allocation17_spill]] %s2983_s19  ;;  %p164_p1 = scmp.eq.s32.totalorder %s3168_s23, 0 }
  0x22   : > { %3666 = sst [smem:[#allocation18_spill]] %s2991_s20  ;;  %p514_p2 = scmp.ne.s32.totalorder %s2971_s29, %s2967_s28 }
  0x23   : > { %3667 = sst [smem:[#allocation19_spill]] %s2995_s21  ;;  %p3178_p3 = por %p164_p1, %p163_p0 }
  0x24   : > { %3668 = sst [smem:[#allocation20_spill]] %s2999_s22  ;;  %p515_p4 = scmp.eq.s32.totalorder %s3168_s23, 3 }
  0x25   : > { %3669 = sst [smem:[#allocation21_spill]] %s3003_s2  ;;  %p520_p5 = scmp.ne.s32.totalorder %s2967_s28, %s2963_s27 }
  0x26   : > { %p521_p6 = scmp.eq.s32.totalorder %s2295_s24, 3  ;;  %p3185_p7 = por %p515_p4, %p514_p2 }
  0x27   : > { %p2296_p8 = scmp.ge.s32.totalorder %s3003_s2, 1  ;;  %p528_p10 = scmp.lt.s32.totalorder %s3003_s2, 5 }
  0x28   : > { %s3671_s18 = scalar_select %p3185_p7, 1, 0 }
  0x29   : > { %p3190_p9 = por %p521_p6, %p520_p5  ;;  %p3195_p11 = pnand %p2296_p8, %p528_p10 }
  0x2a   : > { %3672 = sst [smem:[#allocation22_spill]] %s3671_s18  ;;  %s3005_s25 = smov [#allocation8]  }
  0x2b   : > { %s3673_s17 = scalar_select %p3190_p9, 1, 0 }
  0x2c   : > { %s546_s3 = sshll.u32 %s3005_s25, 4  ;;  %p2567_p12 = pneg %p3195_p11  ;;  %s547_s3 = int_to_ptr.vmem [resolvable:$true] %s546_s3 }
  0x2d   : > { %3674 = sst [smem:[#allocation23_spill]] %s3673_s17  ;;  %s2804_s24 = scalar_lea.vmem %s547_s3, 1024 }
  0x2e   : > { %p2568_p13 = pnand %p2567_p12, %p164_p1  ;;  %p2805_p2 = scmp.ne.s32.totalorder %s547_s3, %s2804_s24 }
  0x2f   : > { %p2812_p6 = scmp.lt.s32.totalorder %s547_s3, %s547_s3  ;;  %p2813_p9 = scmp.lt.s32.totalorder %s2804_s24, %s2804_s24 }
  0x30   : > { %p2795_p0 = pneg %p2568_p13 }
  0x31   : > { %p2814_p7 = por %p2813_p9, %p2812_p6 }
  0x32   : > { %p2807_p4 = pnand %p2805_p2, %p2795_p0 }
  0x34   : > { %p2808_p5 = pneg %p2807_p4 }
  0x36   : > { %p2815_p8 = pnand %p2814_p7, %p2808_p5 }
  0x38   : > { %2818 = shalt.err (!%p2815_p8)
}
  0x39   : > { %s3631_s17 = smov 64   ;;  %s3632_s25 = smov 4  }
  0x3a   : > { %s3676_s16 = sld [smem:[#allocation44_spill]]  ;;  %s46_s24 = sadd.s32 1, %s2995_s21 }
  0x3b   : > { %p47_p7 = scmp.ge.s32.totalorder %s46_s24, 2  ;;  %s49_s15 = sadd.s32 1, %s2999_s22 }
  0x3c   : > { %s150_s14 = sadd.s32 1, %s2983_s19  ;;  %p157_p9 = scmp.ne.s32.totalorder %s2983_s19, %s2979_s0 }
  0x3d   : > { %s3735_s24 = smov (%p47_p7, %s46_s24), 0  ;;  %s3737_s15 = smov (!%p47_p7, %s49_s15), %s2999_s22 }
  0x3e   : > { %3677 = sst [smem:[#allocation24_spill]] %s3735_s24  ;;  %s147_s13 = ssub.s32 %s2995_s21, %s3735_s24 }
  0x3f   : > { %p158_p10 = scmp.eq.s32.totalorder %s3003_s2, 0  ;;  %p51_p12 = scmp.ge.s32.totalorder %s3737_s15, 2 }
  0x40   : > { %2570 = dma.hbm_to_vmem [thread:$0]  (!%p2568_p13), %s3676_s16, 1024, %s547_s3, [#allocation7], %s3631_s17, %s3631_s17, %s3632_s25  }
  0x41   : > { %p148_p0 = scmp.eq.s32.totalorder %s147_s13, 0  ;;  %p159_p2 = por %p158_p10, %p157_p9 }
  0x42   : > { %p2583_p13 = scmp.lt.s32.totalorder %s3003_s2, 4  ;;  %s3739_s15 = smov (%p51_p12, %s3737_s15), 0 }
  0x43   : > { %3678 = sst [smem:[#allocation25_spill]] %s3739_s15  ;;  %s501_s18 = ssub.s32 %s2999_s22, %s3739_s15 }
  0x44   : > { %s3224_s3 = scalar_select %p148_p0, %s2983_s19, %s150_s14  }
  0x45   : > { %s3229_s27 = sand.u32 1, %s2983_s19   ;;  %p502_p4 = scmp.eq.s32.totalorder %s501_s18, 0 }
  0x46   : > { %3679 = sst [smem:[#allocation26_spill]] %s3224_s3  ;;  %s2553_s17 = smul.u32 192, %s3229_s27 }
  0x47   : > { %p3232_p5 = pnand %p2583_p13, %p159_p2  ;;  %s3681_s16 = sadd.s32 1, %s2971_s29 }
  0x48   : > { %s3239_s13 = scalar_select %p502_p4, %s2971_s29, %s3681_s16  }
  0x49   : > { %s2554_s24 = smul.u32 3072, %s2995_s21  ;;  %s580_s11 = scalar_lea.vmem [#allocation3], %s2553_s17 }
  0x4a   : > { %3682 = sst [smem:[#allocation27_spill]] %s3239_s13  ;;  %s587_s14 = sshll.u32 %s580_s11, 4  ;;  %s588_s14 = int_to_ptr.vmem [resolvable:$true] %s587_s14 }
  0x4b   : > { %s3683_s4 = sld [smem:[#allocation33_spill]]  ;;  %s577_s19 = scalar_lea.sflag [#allocation4], %s3229_s27 }
  0x4c   : > { %p2821_p6 = pneg %p3232_p5  ;;  %s2832_s18 = scalar_lea.vmem %s588_s14, 3072 }
  0x4d   : > { %p2833_p8 = scmp.ne.s32.totalorder %s588_s14, %s2832_s18  ;;  %s3008_s10 = smov [#allocation3]  }
  0x4e   : > { %s2837_s16 = sshll.u32 %s3008_s10, 4  ;;  %s2838_s16 = int_to_ptr.vmem [resolvable:$false] %s2837_s16 }
  0x4f   : > { %p2835_p7 = pnand %p2833_p8, %p2821_p6  ;;  %s2839_s13 = scalar_lea.vmem %s2838_s16, 6144 }
  0x50   : > { %p2840_p10 = scmp.lt.s32.totalorder %s588_s14, %s2838_s16  ;;  %p2841_p12 = scmp.lt.s32.totalorder %s2839_s13, %s2832_s18 }
  0x51   : > { %s586_s22 = scalar_lea.hbm %s3683_s4, %s2554_s24  ;;  %p2836_p9 = pneg %p2835_p7 }
  0x52   : > { %p2842_p0 = por %p2841_p12, %p2840_p10 }
  0x54   : > { %p2843_p2 = pnand %p2842_p0, %p2836_p9 }
  0x56   : > { %2846 = shalt.err (!%p2843_p2)
}
  0x57   : > { %s3009_s11 = smov 192   ;;  %s3010_s15 = smov 12  }
  0x58   : > { %2574 = dma.hbm_to_vmem [thread:$0]  (!%p3232_p5), %s586_s22, 3072, %s588_s14, %s577_s19, %s3009_s11, %s3009_s11, %s3010_s15  }
  0x59   : > { %s645_s17 = sand.u32 1, %s3003_s2   ;;  %s2300_s24 = sshll.u32 %s3229_s27, 7 }
  0x5a   : > { %s2404_s3 = sshll.u32 %s2995_s21, 11  ;;  %s649_s10 = scalar_lea.vmem [#allocation6], %s2300_s24 }
  0x5b   : > { %s656_s4 = sshll.u32 %s649_s10, 4  ;;  %s3684_s12 = sld [smem:[#allocation40_spill]]  ;;  %s657_s4 = int_to_ptr.vmem [resolvable:$true] %s656_s4 }
  0x5c   : > { %s646_s18 = scalar_lea.sflag [#allocation7], %s645_s17  ;;  %s2860_s9 = scalar_lea.vmem %s657_s4, 2048 }
  0x5d   : > { %p2861_p13 = scmp.ne.s32.totalorder %s657_s4, %s2860_s9  ;;  %s3011_s8 = smov [#allocation6]  }
  0x5e   : > { %s2865_s6 = sshll.u32 %s3011_s8, 4  ;;  %s2866_s6 = int_to_ptr.vmem [resolvable:$false] %s2865_s6 }
  0x5f   : > { %p2863_p4 = pnand %p2861_p13, %p2821_p6  ;;  %s2867_s19 = scalar_lea.vmem %s2866_s6, 4096 }
  0x60   : > { %p2868_p7 = scmp.lt.s32.totalorder %s657_s4, %s2866_s6  ;;  %p2869_p9 = scmp.lt.s32.totalorder %s2867_s19, %s2860_s9 }
  0x61   : > { %s655_s13 = scalar_lea.hbm %s3684_s12, %s2404_s3  ;;  %p2864_p8 = pneg %p2863_p4 }
  0x62   : > { %p2870_p10 = por %p2869_p9, %p2868_p7 }
  0x64   : > { %p2871_p12 = pnand %p2870_p10, %p2864_p8 }
  0x66   : > { %2874 = shalt.err (!%p2871_p12)
}
  0x67   : > { %s3685_s29 = smov 4   ;;  %s3686_s22 = smov 64  }
  0x68   : > { %2577 = dma.hbm_to_vmem [thread:$0]  (!%p3232_p5), %s655_s13, 2048, %s657_s4, %s646_s18, %s3686_s22, %s3686_s22, %s3685_s29  }
  0x69   : > { %686 = sbr.rel (%p3195_p11) target bundleno = 3024 (0xbd0), region = 92 }
  0x6e   : > { %s688_s27 = sand.u32 1, %s2979_s0  }
  0x6f   : > { %s2555_s8 = smul.u32 192, %s688_s27  ;;  %s689_s14 = scalar_lea.sflag [#allocation4], %s688_s27 }
  0x71   : > { %s3270_s11 = scalar_lea.vmem [#allocation3], %s2555_s8 }
  0x72   : > { %2946 = dma.done.wait (%p3178_p3), %s689_s14, 3072  }
  0x73   : > { %2948 = vsyncadd (%p3178_p3), %s689_s14, 4294964224  ;;  %s697_s6 = sand.u32 1, %s3168_s23   ;;  %s2304_s9 = sshll.u32 %s688_s27, 7 }
  0x74   : > { %s698_s4 = scalar_lea.sflag [#allocation7], %s697_s6  ;;  %s3277_s25 = scalar_lea.vmem [#allocation6], %s2304_s9 }
  0x75   : > { %3687 = sst [smem:[#allocation28_spill]] %s3277_s25 }
  0x76   : > { %2950 = dma.done.wait (%p3178_p3), %s698_s4, 2048  }
  0x77   : > { %2952 = vsyncadd (%p3178_p3), %s698_s4, 4294965248 }
  0x78   : > { %2954 = dma.done.wait (%p164_p1), [#allocation7], 1024  }
  0x79   : > { %2956 = vsyncadd (%p164_p1), [#allocation7], 4294966272  ;;  %p805_p11 = scmp.lt.s32.totalorder %s2991_s20, 1  ;;  %p812_p5 = scmp.lt.s32.totalorder %s2987_s1, 1 }
  0x7a   : > { %s3689_s18 = sld [smem:[#allocation29_spill]]  ;;  %s3699_s2 = sand.u32 1, %s2967_s28  }
  0x7b   : > { %s3291_s15 = scalar_select %p805_p11, %s2991_s20, 1 }
  0x7c   : > { %s3294_s26 = scalar_select %p812_p5, %s2987_s1, 1 }
  0x7d   : > { %s2306_s23 = sshll.u32 %s3291_s15, 2  ;;  %s3690_s5 = sld [smem:[#allocation34_spill]] }
  0x7e   : > { %s2556_s29 = smul.u32 3, %s3294_s26  ;;  %s2405_s22 = sshll.u32 %s3294_s26, 6 }
  0x7f   : > { %s3691_s24 = sld [smem:[#allocation35_spill]]  ;;  %s2406_s27 = sshll.u32 %s3294_s26, 7 }
  0x80   : > { %s808_s19 = scalar_lea.vmem %s3689_s18, %s2306_s23  ;;  %s2311_s8 = sshll.u32 %s3294_s26, 1 }
  0x81   : > { %s3694_s6 = sld [smem:[#allocation38_spill]]  ;;  %s3354_s14 = scalar_lea.vmem [#allocation9], %s3699_s2 }
  0x82   : > { %s3695_s30 = sld [smem:[#allocation39_spill]]  ;;  %p2312_p1 = scmp.ne.s32.totalorder %s2987_s1, 0 }
  0x83   : > { %s3313_s4 = scalar_lea.vmem %s3690_s5, %s2556_s29  ;;  %s3696_s10 = sld [smem:[#allocation41_spill]] }
  0x84   : > { %s3697_s12 = sld [smem:[#allocation42_spill]] }
  0x85   : > { %s3318_s3 = scalar_lea.vmem %s3691_s24, %s2405_s22  ;;  %s3698_s20 = sld [smem:[#allocation43_spill]] }
  0x87   : > { %s3333_s29 = scalar_lea.vmem %s3694_s6, %s2406_s27  ;;  %852 = sbr.rel (%p2312_p1) target bundleno = 450 (0x1c2), region = 108 }
  0x88   : > { %s3338_s22 = scalar_lea.vmem %s3695_s30, %s2311_s8 }
  0x89   : > { %s841_s16 = scalar_lea.vmem %s3696_s10, %s3294_s26 }
  0x8a   : > { %s844_s21 = scalar_lea.vmem %s3697_s12, %s3294_s26 }
  0x8b   : > { %s847_s25 = scalar_lea.vmem %s3698_s20, %s3294_s26  ;;  %s3700_s20 = sld [smem:[#allocation31_spill]] (!%p2312_p1) }
  0x8c   : > { %v853_v0 = vld [vmem:[%s808_s19] sm:$0xf]  ;;  %s3701_s19 = sld [smem:[#allocation32_spill]] }
  0x8d   : > { %v854_v1 = vunpack.c.l.bf16 %v853_v0 }
  0x8f   : > { %857 = vadd.xlane.f32.xlu0 %v854_v1 }
  0x91   : > { %v2313_v10 = vld [vmem:[%s3700_s20] ss:$0 sm:$0xff] }
  0x92   : > { %v2314_v12 = vld [vmem:[%s3701_s19] ss:$0 sm:$0xff] }
 0x118   : > { %v858_v2 = vpop.xlane.xlu0 %857 }
 0x119   : > { %v860_v3 = vmul.f32 0.0078125, %v858_v2 }
 0x11b   : > { %v861_v4 = vsub.f32 %v854_v1, %v860_v3 }
 0x11d   : > { %v862_v5 = vmul.f32 %v861_v4, %v861_v4 }
 0x11f   : > { %863 = vadd.xlane.f32.xlu0 %v862_v5 }
 0x1a8   : > { %v864_v6 = vpop.xlane.xlu0 %863 }
 0x1a9   : > { %v865_v7 = vmul.f32 0.0078125, %v864_v6 }
 0x1ab   : > { %v866_v8 = vadd.f32 1e-12, %v865_v7 }
 0x1ad   : > { %2685 = vrsqrt.f32 %v866_v8 }
 0x1ba   : > { %v2686_v9 = vpop.eup %2685 }
 0x1bb   : > { %v868_v11 = vmul.f32 %v2686_v9, %v861_v4 }
 0x1bd   : > { %v875_v13 = vmul.f32 %v2313_v10, %v868_v11 }
 0x1bf   : > { %v882_v14 = vadd.f32 %v2314_v12, %v875_v13 }
 0x1c1   : > { %883 = vst [vmem:[#allocation2] sm:$0xff] %v882_v14 }
 0x1c2 PF: > { %v2687_v15 = vld [vmem:[%s3270_s11 + $0xac] ss:$12 sps:$4 sm:$0xff]   ;;  %v2689_v16 = vld [vmem:[%s3270_s11 + $0xa8] ss:$12 sps:$4 sm:$0xff]   ;;  %v3012_v17 = vmov 0   ;;  %v3013_v34 = vmov 0.0   ;;  %v921_v35 = vlaneseq  ;;  %s3704_s30 = scalar_lea.vmem %s3613_s7, %s3294_s26 }
 0x1c3   : > { %1096 = vmatprep.mubr.bf16.mxu0 %v3012_v17  ;;  %1064 = vmatprep.subr.bf16.mxu0 %v2687_v15  ;;  %v2690_v18 = vld [vmem:[%s3270_s11 + $0x94] ss:$12 sps:$4 sm:$0xff]   ;;  %v2692_v19 = vld [vmem:[%s3270_s11 + $0x90] ss:$12 sps:$4 sm:$0xff]   ;;  %v2695_v21 = vld [vmem:[%s3270_s11 + $0x78] ss:$12 sps:$4 sm:$0xff]  }
 0x1c4   : > { %1065 = vmatpush1.bf16.msra.mxu0 %v2689_v16  ;;  %v2693_v20 = vld [vmem:[%s3270_s11 + $0x7c] ss:$12 sps:$4 sm:$0xff]   ;;  %v2696_v22 = vld [vmem:[%s3270_s11 + $0x64] ss:$12 sps:$4 sm:$0xff]   ;;  %v2698_v23 = vld [vmem:[%s3270_s11 + $0x60] ss:$12 sps:$4 sm:$0xff]   ;;  %2465 = vmatprep.subr.bf16.mxu1 %v3013_v34 }
 0x1c5   : > { %1066 = vmatprep.subr.bf16.mxu0 %v2690_v18  ;;  %v2699_v24 = vld [vmem:[%s3270_s11 + $0x4c] ss:$12 sps:$4 sm:$0xff]   ;;  %v2701_v25 = vld [vmem:[%s3270_s11 + $0x48] ss:$12 sps:$4 sm:$0xff]   ;;  %v2704_v27 = vld [vmem:[%s3270_s11 + $0x30] ss:$12 sps:$4 sm:$0xff]  }
 0x1c6   : > { %v2702_v26 = vld [vmem:[%s3270_s11 + $0x34] ss:$12 sps:$4 sm:$0xff]   ;;  %v2705_v28 = vld [vmem:[%s3270_s11 + $0x1c] ss:$12 sps:$4 sm:$0xff]   ;;  %v2707_v29 = vld [vmem:[%s3270_s11 + $0x18] ss:$12 sps:$4 sm:$0xff]  }
 0x1c7   : > { %v2708_v30 = vld [vmem:[%s3270_s11 + $0x4] ss:$12 sps:$4 sm:$0xff]   ;;  %v2710_v31 = vld [vmem:[%s3270_s11] ss:$12 sps:$4 sm:$0xff]   ;;  %vm3014_vm0 = vmmov 0   ;;  %v3390_v36 = vshrl.u32 %v921_v35, 7 }
 0x1c8   : > { %1067 = vmatpush1.bf16.msra.mxu0 %v2692_v19  ;;  %v3380_v32 = vld [vmem:[#allocation2] sm:$0xff]  ;;  %2481 = vmatprep.mubr.msk.bf16.mxu1 %vm3014_vm0, %v3013_v34  ;;  %vm1170_vm1 = vcmask 523264   ;;  %v2713_v53 = vld [vmem:[%s3270_s11 + $0x80] ss:$12 sps:$4 sm:$0xff]   ;;  %v2714_v54 = vld [vmem:[%s3270_s11 + $0x68] ss:$12 sps:$4 sm:$0xff]  }
 0x1c9   : > { %1068 = vmatprep.subr.bf16.mxu0 %v2693_v20  ;;  %v886_v33 = vpack.c.bf16 %v3380_v32, %v3380_v32  ;;  %v927_v37 = vsub.s32 1, %v3390_v36  ;;  %v923_v38 = vsub.s32 0, %v3390_v36  ;;  %v3395_v39 = vld [vmem:[%s3313_s4] sm:$0x7]  ;;  %s3015_s4 = smov 64   ;;  %s3702_s6 = sld [smem:[#allocation30_spill]] }
 0x1ca   : > { %v2711_v51 = vld [vmem:[%s3270_s11 + $0xb0] ss:$12 sps:$4 sm:$0xff]   ;;  %v2712_v52 = vld [vmem:[%s3270_s11 + $0x98] ss:$12 sps:$4 sm:$0xff]   ;;  %v2717_v57 = vld [vmem:[%s3270_s11 + $0x20] ss:$12 sps:$4 sm:$0xff]  }
 0x1cb   : > { %v928_v40 = vrot.slane %v3395_v39, %v927_v37  ;;  %v924_v42 = vrot.slane %v3395_v39, %v923_v38  ;;  %2466 = vmatpush3.bf16.msra.mxu1 %v2711_v51  ;;  %v2715_v55 = vld [vmem:[%s3270_s11 + $0x50] ss:$12 sps:$4 sm:$0xff]   ;;  %v2716_v56 = vld [vmem:[%s3270_s11 + $0x38] ss:$12 sps:$4 sm:$0xff]   ;;  %v2718_v58 = vld [vmem:[%s3270_s11 + $0x8] ss:$12 sps:$4 sm:$0xff]  }
 0x1cc   : > { %1069 = vmatpush1.bf16.msra.mxu0 %v2695_v21  ;;  %2467 = vmatprep.subr.bf16.mxu1 %v3013_v34  ;;  %vm1217_vm2 = vcmask 64512   ;;  %v931_v14 = vsub.s32 2, %v3390_v36  ;;  %vm1233_vm3 = vcmask 1043456   ;;  %v2721_v51 = vld [vmem:[%s3318_s3 + $0x8] sm:$0xff]   ;;  %s3705_s17 = sld [smem:[#allocation28_spill]]  ;;  %p2392_p3 = scmp.ne.s32.totalorder %s2987_s1, 1 }
 0x1cd   : > { %1070 = vmatprep.subr.bf16.mxu0 %v2696_v22  ;;  %s3706_s13 = sld [smem:[#allocation36_spill]] }
 0x1ce   : > { %v932_v16 = vrot.slane %v3395_v39, %v931_v14  ;;  %s3708_s2 = sld [smem:[#allocation37_spill]] }
 0x1cf   : > { %2468 = vmatpush3.bf16.msra.mxu1 %v2712_v52  ;;  %s3703_s9 = scalar_lea.vmem %s3702_s6, %s3291_s15  ;;  %v2722_v52 = vld [vmem:[%s3318_s3] sm:$0xff]  }
 0x1d0   : > { %1071 = vmatpush1.bf16.msra.mxu0 %v2698_v23  ;;  %2469 = vmatprep.subr.bf16.mxu1 %v3013_v34  ;;  %v2339_v62 = vld [vmem:[%s3703_s9] ss:$0 sm:$0xff] }
 0x1d1   : > { %1072 = vmatprep.subr.bf16.mxu0 %v2699_v24 }
 0x1d3   : > { %2470 = vmatpush3.bf16.msra.mxu1 %v2713_v53  ;;  %v2726_v53 = vld [vmem:[%s3318_s3 + $0x20] sm:$0xff]   ;;  %s3707_s12 = scalar_lea.vmem %s3706_s13, %s3294_s26 }
 0x1d4   : > { %1073 = vmatpush1.bf16.msra.mxu0 %v2701_v25  ;;  %2471 = vmatprep.subr.bf16.mxu1 %v3013_v34  ;;  %s3709_s5 = scalar_lea.vmem %s3708_s2, %s3294_s26  ;;  %s3713_s26 = sld [smem:[#allocation45_spill]] (!%p2392_p3) }
 0x1d5   : > { %1074 = vmatprep.subr.bf16.mxu0 %v2702_v26 }
 0x1d7   : > { %2472 = vmatpush3.bf16.msra.mxu1 %v2714_v54 }
 0x1d8   : > { %1075 = vmatpush1.bf16.msra.mxu0 %v2704_v27  ;;  %2473 = vmatprep.subr.bf16.mxu1 %v3013_v34 }
 0x1d9   : > { %1076 = vmatprep.subr.bf16.mxu0 %v2705_v28 }
 0x1db   : > { %2474 = vmatpush3.bf16.msra.mxu1 %v2715_v55 }
 0x1dc   : > { %1077 = vmatpush1.bf16.msra.mxu0 %v2707_v29  ;;  %2475 = vmatprep.subr.bf16.mxu1 %v3013_v34 }
 0x1dd   : > { %1078 = vmatprep.subr.bf16.mxu0 %v2708_v30 }
 0x1df   : > { %2476 = vmatpush3.bf16.msra.mxu1 %v2716_v56 }
 0x1e0   : > { %1079 = vmatpush1.bf16.msra.mxu0 %v2710_v31  ;;  %2477 = vmatprep.subr.bf16.mxu1 %v3013_v34 }
 0x1e1   : > { %2485 = vmatprep.subr.bf16.mxu0 %v3013_v34 }
 0x1e3   : > { %1097 = vmatmul.mubr.bf16.vlgmr.msra.gmra.mxu0 %v886_v33  ;;  %2478 = vmatpush3.bf16.msra.mxu1 %v2717_v57 }
 0x1e4   : > { %2487 = vmatprep.mubr.msk.bf16.mxu0 %vm3014_vm0, %v3013_v34  ;;  %2479 = vmatprep.subr.bf16.mxu1 %v3013_v34 }
 0x1e7   : > { %2480 = vmatpush3.bf16.msra.mxu1 %v2718_v58 }
 0x1e8   : > { %2491 = vmatprep.subr.bf16.mxu1 %v3013_v34 }
 0x1ea   : > { %2482 = vmatmul.mubr.bf16.vlgmr.msra.gmra.mxu1 %v886_v33 }
 0x1eb   : > { %2493 = vmatprep.mubr.msk.bf16.mxu1 %vm3014_vm0, %v3013_v34 }
 0x2a3   : > { %v1098_v41 = vpop.f32.mrf.mxu0 }
 0x2a4   : > { %v1099_v46 = vadd.f32 %v1098_v41, %v924_v42  ;;  %v2724_v41 = vld [vmem:[%s3318_s3 + $0x30] sm:$0xff]   ;;  %v2725_v42 = vld [vmem:[%s3318_s3 + $0x28] sm:$0xff]  }
 0x2a5   : > { %v1100_v43 = vpop.f32.mrf.mxu0 }
 0x2a6   : > { %v1101_v44 = vadd.f32 %v1100_v43, %v928_v40  ;;  %v1161_v50 = vpack.c.bf16 %v1099_v46, %v1099_v46  ;;  %v2723_v40 = vld [vmem:[%s3318_s3 + $0x38] sm:$0xff]  }
 0x2a7   : > { %v1102_v45 = vpop.f32.mrf.mxu0 }
 0x2a8   : > { %v1162_v47 = vpack.c.bf16 %v1101_v44, %v1101_v44 }
 0x2a9   : > { %v1103_v48 = vpop.f32.mrf.mxu0 }
 0x2aa   : > { %v1175_v49 = vsel %vm1170_vm1, %v1162_v47, 0  ;;  %1282 = vrot.lane.b32.xlu0 %v1162_v47, %s3015_s4  ;;  %v1139_v15 = vpop.f32.mrf.mxu1  ;;  %v2719_v48 = vld [vmem:[%s3318_s3 + $0x18] sm:$0xff]  }
 0x2ab   : > { %2486 = vmatpush3.bf16.xpose.msra.mxu0 %v1175_v49  ;;  %v1140_v19 = vadd.f32 %v1139_v15, %v932_v16 }
 0x2ac   : > { %2497 = vmatprep.subr.bf16.mxu0 %v3013_v34  ;;  %v2483_v18 = vpop.f32.mrf.mxu1 }
 0x2ad   : > { %v1163_v21 = vpack.c.bf16 %v1140_v19, %v1140_v19  ;;  %v2735_v18 = vld [vmem:[%s3333_s29 + $0x54] ss:$8 sps:$4 sm:$0xff]   ;;  %v2733_v19 = vld [vmem:[%s3333_s29 + $0x50] ss:$8 sps:$4 sm:$0xff]  }
 0x2ae   : > { %1279 = vrot.lane.b32.xlu0 %v1161_v50, %s3015_s4  ;;  %v1142_v20 = vpop.f32.mrf.mxu1 }
 0x2af   : > { %v1235_v23 = vsel %vm1233_vm3, %v1163_v21, 0  ;;  %v2736_v20 = vld [vmem:[%s3333_s29 + $0x40] ss:$8 sps:$4 sm:$0xff]  }
 0x2b0   : > { %v2484_v22 = vpop.f32.mrf.mxu1  ;;  %2492 = vmatpush3.bf16.msra.mxu1 %v1235_v23  ;;  %v2739_v23 = vld [vmem:[%s3333_s29 + $0x30] ss:$8 sps:$4 sm:$0xff]  }
 0x2b1   : > { %2503 = vmatprep.subr.bf16.mxu1 %v3013_v34  ;;  %v2741_v22 = vld [vmem:[%s3333_s29 + $0x34] ss:$8 sps:$4 sm:$0xff]  }
 0x2b2   : > { %2488 = vmatmul.mubr.msk.bf16.vlgmr.msra.gmra.mxu0 %vm1170_vm1, %v1161_v50  ;;  %v2720_v50 = vld [vmem:[%s3318_s3 + $0x10] sm:$0xff]  }
 0x2b3   : > { %2499 = vmatprep.mubr.msk.bf16.mxu0 %vm3014_vm0, %v3013_v34 }
 0x31c   : > { %v1283_v59 = vpop.permute.xlu0 %1282 }
 0x31d   : > { %v1288_v60 = vsel %vm1170_vm1, %v1283_v59, 0 }
 0x31e   : > { %2498 = vmatpush3.bf16.xpose.msra.mxu0 %v1288_v60 }
 0x31f   : > { %2509 = vmatprep.subr.bf16.mxu0 %v3013_v34 }
 0x320   : > { %v1280_v61 = vpop.permute.xlu0 %1279 }
 0x325   : > { %2500 = vmatmul.mubr.msk.bf16.vlgmr.msra.gmra.mxu0 %vm1170_vm1, %v1280_v61 }
 0x326   : > { %2517 = vmatprep.mubr.msk.bf16.mxu0 %vm3014_vm0, %v3013_v34  ;;  %2510 = vmatpush3.bf16.msra.mxu0 %v2723_v40 }
 0x327   : > { %2511 = vmatprep.subr.bf16.mxu0 %v3013_v34 }
 0x32a   : > { %2512 = vmatpush3.bf16.msra.mxu0 %v2724_v41  ;;  %v2356_v41 = vld [vmem:[%s3709_s5] ss:$0 sm:$0xff] }
 0x32b   : > { %2513 = vmatprep.subr.bf16.mxu0 %v3013_v34 }
 0x32e   : > { %2514 = vmatpush3.bf16.msra.mxu0 %v2725_v42 }
 0x32f   : > { %2515 = vmatprep.subr.bf16.mxu0 %v3013_v34 }
 0x332   : > { %2516 = vmatpush3.bf16.msra.mxu0 %v2726_v53  ;;  %v2759_v53 = vld [vmem:[%s3705_s17 + $0x58] sm:$0xff]  }
 0x372   : > { %v1211_v63 = vpop.f32.mrf.mxu0 }
 0x373   : > { %v1212_v0 = vadd.f32 %v2339_v62, %v1211_v63 }
 0x374   : > { %v2489_v1 = vpop.f32.mrf.mxu0 }
 0x375   : > { %v1218_v2 = vsel %vm1217_vm2, %v1212_v0, -inf }
 0x376   : > { %1219 = vmax.xlane.f32.xlu1 %v1218_v2  ;;  %v1214_v3 = vpop.f32.mrf.mxu0 }
 0x378   : > { %v2490_v4 = vpop.f32.mrf.mxu0 }
 0x379   : > { %v2354_v4 = vld [vmem:[%s3704_s30] ss:$0 sm:$0xff] }
 0x3e5   : > { %v1324_v5 = vpop.f32.mrf.mxu0 }
 0x3e6   : > { %v1325_v6 = vadd.f32 %v2339_v62, %v1324_v5 }
 0x3e7   : > { %v2501_v7 = vpop.f32.mrf.mxu0 }
 0x3e8   : > { %v1330_v8 = vsel %vm1217_vm2, %v1325_v6, -inf }
 0x3e9   : > { %1331 = vmax.xlane.f32.xlu1 %v1330_v8  ;;  %v1327_v9 = vpop.f32.mrf.mxu0 }
 0x3eb   : > { %v2502_v10 = vpop.f32.mrf.mxu0 }
 0x3ec   : > { %v2727_v10 = vld [vmem:[%s3333_s29 + $0x70] ss:$8 sps:$4 sm:$0xff]  }
 0x3ff   : > { %v1220_v11 = vpop.xlane.xlu1 %1219 }
 0x400   : > { %v1221_v12 = vsub.f32 %v1212_v0, %v1220_v11  ;;  %v2729_v11 = vld [vmem:[%s3333_s29 + $0x74] ss:$8 sps:$4 sm:$0xff]  }
 0x401   : > { %1672 = vmatprep.subr.bf16.mxu0 %v2729_v11 }
 0x402   : > { %v1222_v13 = vmul.f32 1.442695, %v1221_v12  ;;  %v2732_v12 = vld [vmem:[%s3333_s29 + $0x64] ss:$8 sps:$4 sm:$0xff]  }
 0x404   : > { %2767 = vpow2.f32 %v1222_v13  ;;  %v2730_v13 = vld [vmem:[%s3333_s29 + $0x60] ss:$8 sps:$4 sm:$0xff]  }
 0x411   : > { %v2768_v24 = vpop.eup %2767 }
 0x412   : > { %v1224_v25 = vsel %vm1217_vm2, %v2768_v24, 0.0 }
 0x413   : > { %1225 = vadd.xlane.f32.xlu0 %v1224_v25  ;;  %v2742_v25 = vld [vmem:[%s3333_s29 + $0x20] ss:$8 sps:$4 sm:$0xff]  }
 0x472   : > { %v1332_v26 = vpop.xlane.xlu1 %1331 }
 0x473   : > { %v1333_v27 = vsub.f32 %v1325_v6, %v1332_v26  ;;  %v2747_v26 = vld [vmem:[%s3333_s29 + $0x14] ss:$8 sps:$4 sm:$0xff]  }
 0x475   : > { %v1334_v28 = vmul.f32 1.442695, %v1333_v27  ;;  %v2745_v27 = vld [vmem:[%s3333_s29 + $0x10] ss:$8 sps:$4 sm:$0xff]  }
 0x477   : > { %2769 = vpow2.f32 %v1334_v28  ;;  %v2750_v28 = vld [vmem:[%s3333_s29 + $0x4] ss:$8 sps:$4 sm:$0xff]  }
 0x484   : > { %v2770_v29 = vpop.eup %2769 }
 0x485   : > { %v1336_v30 = vsel %vm1217_vm2, %v2770_v29, 0.0 }
 0x486   : > { %1337 = vadd.xlane.f32.xlu1 %v1336_v30 }
 0x497   : > { %1343 = vrot.lane.b32.xlu1 %v1163_v21, %s3015_s4  ;;  %v2738_v21 = vld [vmem:[%s3333_s29 + $0x44] ss:$8 sps:$4 sm:$0xff]  }
 0x49c   : > { %v1226_v31 = vpop.xlane.xlu0 %1225 }
 0x49d   : > { %2771 = vrcp.f32 %v1226_v31 }
 0x4aa   : > { %v2772_v33 = vpop.eup %2771 }
 0x4ab   : > { %v1228_v35 = vmul.f32 %v2772_v33, %v2768_v24  ;;  %v2744_v24 = vld [vmem:[%s3333_s29 + $0x24] ss:$8 sps:$4 sm:$0xff]  }
 0x4ad   : > { %v1229_v39 = vpack.c.bf16 %v1228_v35, %v1228_v35 }
 0x4af   : > { %2494 = vmatmul.mubr.msk.bf16.vlgmr.msra.gmra.mxu1 %vm1217_vm2, %v1229_v39  ;;  %v2355_v39 = vld [vmem:[%s3707_s12] ss:$0 sm:$0xff] }
 0x4b0   : > { %2505 = vmatprep.mubr.msk.bf16.mxu1 %vm3014_vm0, %v3013_v34 }
 0x50f   : > { %v1338_v43 = vpop.xlane.xlu1 %1337 }
 0x510   : > { %2773 = vrcp.f32 %v1338_v43 }
 0x513   : > { %v1344_v44 = vpop.permute.xlu1 %1343 }
 0x514   : > { %v1349_v45 = vsel %vm1233_vm3, %v1344_v44, 0 }
 0x515   : > { %2504 = vmatpush3.bf16.msra.mxu1 %v1349_v45  ;;  %v2751_v45 = vld [vmem:[%s3705_s17 + $0x78] sm:$0xff]  }
 0x516   : > { %2521 = vmatprep.subr.bf16.mxu1 %v3013_v34 }
 0x51d   : > { %v2774_v46 = vpop.eup %2773 }
 0x51e   : > { %v1340_v47 = vmul.f32 %v2774_v46, %v2770_v29  ;;  %v2748_v29 = vld [vmem:[%s3333_s29] ss:$8 sps:$4 sm:$0xff]   ;;  %v2752_v46 = vld [vmem:[%s3705_s17 + $0x38] sm:$0xff]  }
 0x520   : > { %v1341_v49 = vpack.c.bf16 %v1340_v47, %v1340_v47  ;;  %v2753_v47 = vld [vmem:[%s3705_s17 + $0x70] sm:$0xff]  }
 0x522   : > { %2506 = vmatmul.mubr.msk.bf16.vlgmr.msra.gmra.mxu1 %vm1217_vm2, %v1341_v49  ;;  %v2755_v49 = vld [vmem:[%s3705_s17 + $0x68] sm:$0xff]  }
 0x523   : > { %2522 = vmatpush3.bf16.msra.mxu1 %v2719_v48  ;;  %2529 = vmatprep.mubr.msk.bf16.mxu1 %vm3014_vm0, %v3013_v34  ;;  %v2754_v48 = vld [vmem:[%s3705_s17 + $0x30] sm:$0xff]  }
 0x524   : > { %2523 = vmatprep.subr.bf16.mxu1 %v3013_v34 }
 0x527   : > { %2524 = vmatpush3.bf16.msra.mxu1 %v2720_v50  ;;  %v2756_v50 = vld [vmem:[%s3705_s17 + $0x28] sm:$0xff]  }
 0x528   : > { %2525 = vmatprep.subr.bf16.mxu1 %v3013_v34 }
 0x52b   : > { %2526 = vmatpush3.bf16.msra.mxu1 %v2721_v51  ;;  %v2757_v51 = vld [vmem:[%s3705_s17 + $0x60] sm:$0xff]  }
 0x52c   : > { %2527 = vmatprep.subr.bf16.mxu1 %v3013_v34 }
 0x52f   : > { %2528 = vmatpush3.bf16.msra.mxu1 %v2722_v52  ;;  %v2758_v52 = vld [vmem:[%s3705_s17 + $0x20] sm:$0xff]  }
 0x530   : > { %2434 = vmatprep.subr.bf16.mxu1 %v2751_v45 }
 0x56f   : > { %v1271_v54 = vpop.f32.mrf.mxu1 }
 0x570   : > { %v1277_v55 = vpack.c.bf16 %v1271_v54, %v1271_v54  ;;  %v2760_v54 = vld [vmem:[%s3705_s17 + $0x18] sm:$0xff]  }
 0x571   : > { %v2495_v56 = vpop.f32.mrf.mxu1 }
 0x572   : > { %2530 = vmatmul.mubr.msk.bf16.vlgmr.msra.gmra.mxu1 %vm1170_vm1, %v1277_v55  ;;  %v2761_v55 = vld [vmem:[%s3705_s17 + $0x50] sm:$0xff]  }
 0x573   : > { %v1274_v57 = vpop.f32.mrf.mxu1  ;;  %2435 = vmatpush3.bf16.msra.mxu1 %v2752_v46  ;;  %v2762_v56 = vld [vmem:[%s3705_s17 + $0x10] sm:$0xff]  }
 0x574   : > { %2436 = vmatprep.subr.bf16.mxu1 %v2753_v47  ;;  %v2763_v57 = vld [vmem:[%s3705_s17 + $0x48] sm:$0xff]  }
 0x575   : > { %v2496_v58 = vpop.f32.mrf.mxu1 }
 0x576   : > { %v2764_v58 = vld [vmem:[%s3705_s17 + $0x8] sm:$0xff]  }
 0x577   : > { %2437 = vmatpush3.bf16.msra.mxu1 %v2754_v48 }
 0x578   : > { %2438 = vmatprep.subr.bf16.mxu1 %v2755_v49 }
 0x57b   : > { %2439 = vmatpush3.bf16.msra.mxu1 %v2756_v50 }
 0x57c   : > { %2440 = vmatprep.subr.bf16.mxu1 %v2757_v51 }
 0x57f   : > { %2441 = vmatpush3.bf16.msra.mxu1 %v2758_v52 }
 0x580   : > { %2442 = vmatprep.subr.bf16.mxu1 %v2759_v53 }
 0x583   : > { %2443 = vmatpush3.bf16.msra.mxu1 %v2760_v54 }
 0x584   : > { %2444 = vmatprep.subr.bf16.mxu1 %v2761_v55 }
 0x587   : > { %2445 = vmatpush3.bf16.msra.mxu1 %v2762_v56 }
 0x588   : > { %2446 = vmatprep.subr.bf16.mxu1 %v2763_v57 }
 0x58b   : > { %2447 = vmatpush3.bf16.msra.mxu1 %v2764_v58 }
 0x5e2   : > { %v1385_v59 = vpop.f32.mrf.mxu1 }
 0x5e3   : > { %v1391_v60 = vpack.c.bf16 %v1385_v59, %v1385_v59  ;;  %v2765_v59 = vld [vmem:[%s3705_s17 + $0x40] sm:$0xff]  }
 0x5e4   : > { %v2507_v61 = vpop.f32.mrf.mxu1  ;;  %2448 = vmatprep.subr.bf16.mxu1 %v2765_v59 }
 0x5e5   : > { %2518 = vmatmul.mubr.msk.bf16.vlgmr.msra.gmra.mxu0 %vm1170_vm1, %v1391_v60  ;;  %v2766_v60 = vld [vmem:[%s3705_s17] sm:$0xff]  }
 0x5e6   : > { %v1388_v62 = vpop.f32.mrf.mxu1  ;;  %1704 = vmatprep.mubr.bf16.mxu0 %v3012_v17  ;;  %1673 = vmatpush1.bf16.msra.mxu0 %v2727_v10  ;;  %v1580_v61 = vld [vmem:[%s3338_s22] sm:$0x3] }
 0x5e7   : > { %1674 = vmatprep.subr.bf16.mxu0 %v2732_v12  ;;  %2449 = vmatpush3.bf16.msra.mxu1 %v2766_v60  ;;  %v1585_v62 = vrot.slane %v1580_v61, %v923_v38 }
 0x5e8   : > { %v2508_v34 = vpop.f32.mrf.mxu1 }
 0x5e9   : > { %v1589_v34 = vrot.slane %v1580_v61, %v927_v37 }
 0x5ea   : > { %1675 = vmatpush1.bf16.msra.mxu0 %v2730_v13 }
 0x5eb   : > { %1676 = vmatprep.subr.bf16.mxu0 %v2735_v18 }
 0x5ee   : > { %1677 = vmatpush1.bf16.msra.mxu0 %v2733_v19 }
 0x5ef   : > { %1678 = vmatprep.subr.bf16.mxu0 %v2738_v21 }
 0x5f2   : > { %1679 = vmatpush1.bf16.msra.mxu0 %v2736_v20 }
 0x5f3   : > { %1680 = vmatprep.subr.bf16.mxu0 %v2741_v22  ;;  %v2373_v22 = vld [vmem:[%s841_s16] ss:$0 sm:$0xff] }
 0x5f6   : > { %1681 = vmatpush1.bf16.msra.mxu0 %v2739_v23 }
 0x5f7   : > { %1682 = vmatprep.subr.bf16.mxu0 %v2744_v24 }
 0x5fa   : > { %1683 = vmatpush1.bf16.msra.mxu0 %v2742_v25 }
 0x5fb   : > { %1684 = vmatprep.subr.bf16.mxu0 %v2747_v26 }
 0x5fe   : > { %1685 = vmatpush1.bf16.msra.mxu0 %v2745_v27 }
 0x5ff   : > { %1686 = vmatprep.subr.bf16.mxu0 %v2750_v28 }
 0x602   : > { %1687 = vmatpush1.bf16.msra.mxu0 %v2748_v29 }
 0x632   : > { %v1520_v63 = vpop.f32.mrf.mxu1 }
 0x634   : > { %v2531_v0 = vpop.f32.mrf.mxu1 }
 0x636   : > { %v1523_v1 = vpop.f32.mrf.mxu1 }
 0x638   : > { %v2532_v2 = vpop.f32.mrf.mxu1 }
 0x6a5   : > { %v1453_v3 = vpop.f32.mrf.mxu0 }
 0x6a6   : > { %v1521_v5 = vadd.f32 %v1520_v63, %v1453_v3 }
 0x6a7   : > { %v2519_v6 = vpop.f32.mrf.mxu0 }
 0x6a8   : > { %v1533_v7 = vadd.f32 %v2354_v4, %v1521_v5 }
 0x6a9   : > { %v1456_v8 = vpop.f32.mrf.mxu0 }
 0x6aa   : > { %v1534_v17 = vadd.f32 %v1533_v7, %v3380_v32 }
 0x6ab   : > { %v2520_v9 = vpop.f32.mrf.mxu0 }
 0x6ac   : > { %1537 = vadd.xlane.f32.xlu1 %v1534_v17 }
 0x735   : > { %v1538_v14 = vpop.xlane.xlu1 %1537 }
 0x736   : > { %v1540_v15 = vmul.f32 0.0078125, %v1538_v14 }
 0x738   : > { %v1541_v32 = vsub.f32 %v1534_v17, %v1540_v15 }
 0x73a   : > { %v1542_v16 = vmul.f32 %v1541_v32, %v1541_v32 }
 0x73c   : > { %1543 = vadd.xlane.f32.xlu0 %v1542_v16 }
 0x7c5   : > { %v1544_v30 = vpop.xlane.xlu0 %1543 }
 0x7c6   : > { %v1545_v31 = vmul.f32 0.0078125, %v1544_v30 }
 0x7c8   : > { %v1546_v33 = vadd.f32 1e-12, %v1545_v31 }
 0x7ca   : > { %2775 = vrsqrt.f32 %v1546_v33 }
 0x7d7   : > { %v2776_v35 = vpop.eup %2775 }
 0x7d8   : > { %v1548_v40 = vmul.f32 %v2776_v35, %v1541_v32 }
 0x7da   : > { %v1555_v42 = vmul.f32 %v2355_v39, %v1548_v40 }
 0x7dc   : > { %v3504_v43 = vadd.f32 %v2356_v41, %v1555_v42  ;;  %v2390_v42 = vld [vmem:[%s844_s21] ss:$0 sm:$0xff] }
 0x7de   : > { %v1563_v44 = vpack.c.bf16 %v3504_v43, %v3504_v43 }
 0x7e0   : > { %1705 = vmatmul.mubr.bf16.vlgmr.msra.gmra.mxu0 %v1563_v44 }
 0x8a0   : > { %v1706_v63 = vpop.f32.mrf.mxu0 }
 0x8a1   : > { %v1707_v0 = vadd.f32 %v1706_v63, %v1585_v62 }
 0x8a2   : > { %v1708_v1 = vpop.f32.mrf.mxu0 }
 0x8a3   : > { %v1713_v2 = vmul.f32 %v1707_v0, %v1707_v0  ;;  %v1709_v3 = vadd.f32 %v1708_v1, %v1589_v34 }
 0x8a4   : > { %v1710_v4 = vpop.f32.mrf.mxu0 }
 0x8a5   : > { %v1715_v5 = vmul.f32 %v1713_v2, %v1707_v0  ;;  %v1714_v6 = vmul.f32 %v1709_v3, %v1709_v3 }
 0x8a6   : > { %v1711_v7 = vpop.f32.mrf.mxu0 }
 0x8a7   : > { %v1717_v8 = vmul.f32 0.044715, %v1715_v5  ;;  %v1716_v17 = vmul.f32 %v1714_v6, %v1709_v3 }
 0x8a9   : > { %v1719_v9 = vadd.f32 %v1717_v8, %v1707_v0  ;;  %v1718_v10 = vmul.f32 0.044715, %v1716_v17 }
 0x8ab   : > { %v1721_v11 = vmul.f32 0.7978846, %v1719_v9  ;;  %v1720_v12 = vadd.f32 %v1718_v10, %v1709_v3 }
 0x8ad   : > { %2777 = vtanh.f32 %v1721_v11  ;;  %v1722_v38 = vmul.f32 0.7978846, %v1720_v12 }
 0x8af   : > { %2779 = vtanh.f32 %v1722_v38 }
 0x8ba   : > { %v2778_v36 = vpop.eup %2777 }
 0x8bb   : > { %v1725_v37 = vadd.f32 1.0, %v2778_v36 }
 0x8bc   : > { %v2780_v13 = vpop.eup %2779 }
 0x8bd   : > { %v1726_v14 = vadd.f32 1.0, %v2780_v13  ;;  %v1727_v15 = vmul.f32 0.5, %v1725_v37 }
 0x8bf   : > { %v1728_v32 = vmul.f32 0.5, %v1726_v14  ;;  %v1729_v16 = vmul.f32 %v1727_v15, %v1707_v0 }
 0x8c1   : > { %v1730_v18 = vmul.f32 %v1728_v32, %v1709_v3  ;;  %v1731_v20 = vpack.c.bf16 %v1729_v16, %v1729_v16 }
 0x8c3   : > { %v1732_v19 = vpack.c.bf16 %v1730_v18, %v1730_v18 }
 0x8c5   : > { %1900 = vmatprep.mubr.bf16.mxu1 %v1732_v19 }
 0x8c6   : > { %1901 = vmatmul.mubr.bf16.vlgmr.msra.gmra.mxu1 %v1731_v20 }
 0x986   : > { %v2450_v21 = vpop.f32.mrf.mxu1 }
 0x988   : > { %v2451_v23 = vpop.f32.mrf.mxu1 }
 0x989   : > { %v2452_v24 = vadd.f32 %v2451_v23, %v2450_v21 }
 0x98a   : > { %v2453_v25 = vpop.f32.mrf.mxu1 }
 0x98b   : > { %v1903_v26 = vadd.f32 %v2452_v24, %v2373_v22 }
 0x98c   : > { %v2454_v27 = vpop.f32.mrf.mxu1 }
 0x98d   : > { %v1908_v28 = vadd.f32 %v1903_v26, %v3504_v43  ;;  %v2391_v43 = vld [vmem:[%s847_s25] ss:$0 sm:$0xff] }
 0x98f   : > { %1911 = vadd.xlane.f32.xlu0 %v1908_v28 }
 0xa18   : > { %v1912_v29 = vpop.xlane.xlu0 %1911 }
 0xa19   : > { %v1913_v30 = vmul.f32 0.0078125, %v1912_v29 }
 0xa1b   : > { %v1914_v31 = vsub.f32 %v1908_v28, %v1913_v30 }
 0xa1d   : > { %v1915_v33 = vmul.f32 %v1914_v31, %v1914_v31 }
 0xa1f   : > { %1916 = vadd.xlane.f32.xlu0 %v1915_v33 }
 0xaa8   : > { %v1917_v35 = vpop.xlane.xlu0 %1916 }
 0xaa9   : > { %v1918_v39 = vmul.f32 0.0078125, %v1917_v35 }
 0xaab   : > { %v1919_v40 = vadd.f32 1e-12, %v1918_v39 }
 0xaad   : > { %2781 = vrsqrt.f32 %v1919_v40 }
 0xaba   : > { %v2782_v41 = vpop.eup %2781 }
 0xabb   : > { %v1921_v44 = vmul.f32 %v2782_v41, %v1914_v31 }
 0xabd   : > { %v1928_v45 = vmul.f32 %v2390_v42, %v1921_v44  ;;  %1940 = sbr.rel (%p2392_p3) target bundleno = 2997 (0xbb5), region = 112 }
 0xabf   : > { %v1935_v46 = vadd.f32 %v2391_v43, %v1928_v45 }
 0xac1   : > { %1936 = vst [vmem:[#allocation2] sm:$0xff] %v1935_v46 }
 0xac2   : > { %v2783_v47 = vld [vmem:[#allocation8 + $0x38] sm:$0xff]   ;;  %v3016_v48 = vmov 0.0   ;;  %v2784_v49 = vld [vmem:[#allocation8 + $0x30] sm:$0xff]   ;;  %vm3017_vm4 = vmmov 0   ;;  %v2785_v50 = vld [vmem:[#allocation8 + $0x28] sm:$0xff]   ;;  %v1941_v56 = vpack.c.bf16 %v1935_v46, %v1935_v46 }
 0xac3   : > { %2533 = vmatprep.subr.bf16.mxu0 %v3016_v48  ;;  %2549 = vmatprep.mubr.msk.bf16.mxu0 %vm3017_vm4, %v3016_v48  ;;  %v2786_v51 = vld [vmem:[#allocation8 + $0x20] sm:$0xff]   ;;  %v2787_v52 = vld [vmem:[#allocation8 + $0x18] sm:$0xff]   ;;  %v2788_v53 = vld [vmem:[#allocation8 + $0x10] sm:$0xff]  }
 0xac4   : > { %2534 = vmatpush3.bf16.msra.mxu0 %v2783_v47  ;;  %v2789_v54 = vld [vmem:[#allocation8 + $0x8] sm:$0xff]   ;;  %v2790_v55 = vld [vmem:[#allocation8] sm:$0xff]   ;;  %v1958_v57 = vld [vmem:[%s3713_s26] sm:$0x1] }
 0xac5   : > { %2535 = vmatprep.subr.bf16.mxu0 %v3016_v48 }
 0xac8   : > { %2536 = vmatpush3.bf16.msra.mxu0 %v2784_v49 }
 0xac9   : > { %2537 = vmatprep.subr.bf16.mxu0 %v3016_v48 }
 0xacc   : > { %2538 = vmatpush3.bf16.msra.mxu0 %v2785_v50 }
 0xacd   : > { %2539 = vmatprep.subr.bf16.mxu0 %v3016_v48 }
 0xad0   : > { %2540 = vmatpush3.bf16.msra.mxu0 %v2786_v51 }
 0xad1   : > { %2541 = vmatprep.subr.bf16.mxu0 %v3016_v48 }
 0xad4   : > { %2542 = vmatpush3.bf16.msra.mxu0 %v2787_v52 }
 0xad5   : > { %2543 = vmatprep.subr.bf16.mxu0 %v3016_v48 }
 0xad8   : > { %2544 = vmatpush3.bf16.msra.mxu0 %v2788_v53 }
 0xad9   : > { %2545 = vmatprep.subr.bf16.mxu0 %v3016_v48 }
 0xadc   : > { %2546 = vmatpush3.bf16.msra.mxu0 %v2789_v54 }
 0xadd   : > { %2547 = vmatprep.subr.bf16.mxu0 %v3016_v48 }
 0xae0   : > { %2548 = vmatpush3.bf16.msra.mxu0 %v2790_v55 }
 0xae3   : > { %2550 = vmatmul.mubr.bf16.vlgmr.msra.gmra.mxu0 %v1941_v56 }
 0xba3   : > { %v2041_v58 = vpop.f32.mrf.mxu0 }
 0xba4   : > { %v2042_v59 = vadd.f32 %v2041_v58, %v1958_v57 }
 0xba5   : > { %v2551_v60 = vpop.f32.mrf.mxu0 }
 0xba6   : > { %2791 = vtanh.f32 %v2042_v59 }
 0xba7   : > { %v2044_v61 = vpop.f32.mrf.mxu0 }
 0xba9   : > { %v2552_v62 = vpop.f32.mrf.mxu0 }
 0xbb3   : > { %v2792_v34 = vpop.eup %2791 }
 0xbb4   : > { %2048 = vst [vmem:[%s3354_s14] sm:$0x1] %v2792_v34 }
 0xbb5 PF: > { %s3714_s21 = sld [smem:[#allocation18_spill]]  ;;  %s2062_s17 = sshll.u32 %s3354_s14, 4  ;;  %s2063_s17 = int_to_ptr.vmem [resolvable:$true] %s2062_s17 }
 0xbb6   : > { %s3715_s8 = sld [smem:[#allocation22_spill]]  ;;  %s3717_s24 = sand.u32 1, %s2967_s28  }
 0xbb7   : > { %s3716_s3 = sld [smem:[#allocation46_spill]]  ;;  %s2050_s10 = scalar_lea.sflag [#allocation5], %s3717_s24 }
 0xbb8   : > { %s2875_s13 = scalar_lea.vmem %s2063_s17, 16  ;;  %s3018_s12 = smov [#allocation9]  }
 0xbb9   : > { %p2876_p6 = scmp.ne.s32.totalorder %s2063_s17, %s2875_s13  ;;  %s2879_s18 = sshll.u32 %s3018_s12, 4  ;;  %s2880_s18 = int_to_ptr.vmem [resolvable:$false] %s2879_s18 }
 0xbba   : > { %s2881_s29 = scalar_lea.vmem %s2880_s18, 32  ;;  %p2882_p4 = scmp.lt.s32.totalorder %s2063_s17, %s2880_s18 }
 0xbbb   : > { %s2401_s6 = sshll.u32 %s3714_s21, 4  ;;  %p2883_p8 = scmp.lt.s32.totalorder %s2881_s29, %s2875_s13 }
 0xbbc   : > { %p3718_p0 = scmp.ne.s32.totalorder %s3715_s8, 0 }
 0xbbd   : > { %s2060_s30 = scalar_lea.hbm %s3716_s3, %s2401_s6  ;;  %p2884_p7 = por %p2883_p8, %p2882_p4 }
 0xbbe   : > { %p2877_p2 = pnand %p2876_p6, %p3718_p0 }
 0xbc0   : > { %p2878_p13 = pneg %p2877_p2 }
 0xbc2   : > { %p2885_p9 = pnand %p2884_p7, %p2878_p13 }
 0xbc4   : > { %2888 = shalt.err (!%p2885_p9)
}
 0xbc5   : > { %s2889_s2 = scalar_lea.hbm %s2060_s30, 16  ;;  %s2893_s22 = scalar_lea.hbm %s3716_s3, 32 }
 0xbc6   : > { %p2890_p10 = scmp.ne.s32.totalorder %s2060_s30, %s2889_s2  ;;  %p2894_p5 = scmp.lt.s32.totalorder %s2060_s30, %s3716_s3 }
 0xbc7   : > { %p2895_p1 = scmp.lt.s32.totalorder %s2893_s22, %s2889_s2 }
 0xbc8   : > { %p2891_p12 = pnand %p2890_p10, %p3718_p0 }
 0xbc9   : > { %p2896_p3 = por %p2895_p1, %p2894_p5 }
 0xbca   : > { %p2892_p11 = pneg %p2891_p12 }
 0xbcc   : > { %p2897_p6 = pnand %p2896_p3, %p2892_p11 }
 0xbce   : > { %2900 = shalt.err (!%p2897_p6)
}
 0xbcf   : > { %2565 = dma.vmem_to_hbm [thread:$0]  (%p3718_p0), %s2063_s17, 16, %s2060_s30, %s2050_s10  }
 0xbd0 PF: > { %s3719_s16 = sld [smem:[#allocation21_spill]] }
 0xbd1   : > { %s3720_s23 = sld [smem:[#allocation14_spill]] }
 0xbd2   : > { %s3721_s27 = sld [smem:[#allocation23_spill]] }
 0xbd6   : > { %p2585_p2 = scmp.ge.s32.totalorder %s3719_s16, 2 }
 0xbd7   : > { %s2074_s19 = sand.u32 1, %s3720_s23  }
 0xbd8   : > { %p3722_p13 = scmp.ne.s32.totalorder %s3721_s27, 0  ;;  %s2075_s4 = scalar_lea.sflag [#allocation5], %s2074_s19 }
 0xbda   : > { %p2579_p4 = pnand %p2585_p2, %p3722_p13 }
 0xbdc   : > { %p2580_p8 = pneg %p2579_p4 }
 0xbde   : > { %2958 = dma.done.wait (%p2580_p8), %s2075_s4, 16  }
 0xbdf   : > { %2960 = vsyncadd (%p2580_p8), %s2075_s4, 4294967280  ;;  %s37_s2 = sadd.s32 1, %s3719_s16   ;;  %s3723_s11 = sld [smem:[#allocation15_spill]] }
 0xbe0   : > { %p34_p7 = scmp.ge.s32.totalorder %s37_s2, 6   ;;  %s3724_s29 = sld [smem:[#allocation27_spill]] }
 0xbe1   : > { %s3725_s30 = sld [smem:[#allocation16_spill]]  ;;  %s3732_s27 = smov %s2967_s28 }
 0xbe2   : > { %s3726_s0 = sld [smem:[#allocation17_spill]] }
 0xbe3   : > { %s3727_s19 = sld [smem:[#allocation26_spill]]  ;;  %36 = sbr.rel (!%p34_p7) target bundleno = 30 (0x1e), region = 198 }
 0xbe4   : > { %s3728_s1 = sld [smem:[#allocation19_spill]] }
 0xbe5   : > { %s3729_s20 = sld [smem:[#allocation20_spill]]  ;;  %s3733_s28 = smov %s3723_s11 }
 0xbe6   : > { %s3730_s21 = sld [smem:[#allocation24_spill]] }
 0xbe7   : > { %s3731_s22 = sld [smem:[#allocation25_spill]] }
 0xbe8   :  { %2079 = vsyncpa [#allocation4], 1 }
 0xbe9   :  { %2081 = vsyncpa [#allocation4 + $0x1], 1 }
 0xbea   :  { %2082 = vsyncpa [#allocation7], 1 }
 0xbeb   :  { %2084 = vsyncpa [#allocation7 + $0x1], 1 }
 0xbec   :  { %2085 = vsyncpa [#allocation5], 1 }
 0xbed   :  { %2087 = vsyncpa [#allocation5 + $0x1], 1 }

</bundles_post_ra>
